<compile_context>
chip_gen: v7x
topology: tpu7x:2x2x1
jax: 0.10.0
libtpu: 0.0.40
codegen_flags: <defaults>
</compile_context>

<pallas_src>
import jax
import jax.numpy as jnp
import numpy as np
from jax import lax
from jax.experimental import pallas as pl
from jax.experimental.pallas import tpu as pltpu

MAG_F_DIM = 3          # mag_f_dim of the module (eye-kernel conv taps)
MODULE_EPS = 1e-12     # MEA.eps
ATAN_EPS = 1e-6        # epsilon inside custom_atan2


def _cos_sin_custom_atan2(y, x):
    """cos/sin of custom_atan2(y, x) without calling atan/cos/sin.

    base = atan(u), u = y/(x+1e-6):  cos(base)=rsqrt(1+u^2), sin(base)=u*rsqrt(1+u^2).
    The reference's +/-pi corrections (y!=0 & x<0) flip both signs; the x==0 cases
    force the angle to +/-pi/2 (cos=0, sin=+/-1)."""
    u = y / (x + ATAN_EPS)
    u = jnp.clip(u, -1e18, 1e18)            # keep u*u finite in f32
    inv = lax.rsqrt(1.0 + u * u)
    c = inv
    s = u * inv
    flip = (x < 0.0) & (y != 0.0)
    c = jnp.where(flip, -c, c)
    s = jnp.where(flip, -s, s)
    x_is0 = x == 0.0
    pos = x_is0 & (y > 0.0)
    neg = x_is0 & (y < 0.0)
    c = jnp.where(pos | neg, 0.0, c)
    s = jnp.where(pos, 1.0, s)
    s = jnp.where(neg, -1.0, s)
    return c, s


def _mea_kernel(wb_ref, x_ref, z_ref, o_ref):
    # wb_ref : SMEM flat f32, [(mag_f_dim+2)*Cz*3 conv weights | (mag_f_dim+2) biases]
    # x_ref  : (1, 2, F, TT)   real/imag of the input STFT
    # z_ref  : (1, Cz, F, TT)  conv features
    # o_ref  : (1, 2, F, TT)   real/imag of the output STFT
    cz = z_ref.shape[1]
    nout = MAG_F_DIM + 2

    xr = x_ref[0, 0]
    xi = x_ref[0, 1]
    fdim, tt = xr.shape
    zero_row = jnp.zeros((1, tt), jnp.float32)

    def tap(a, k):
        # size-3 conv tap along F with zero padding of 1:
        #   k=0 -> a[f-1], k=1 -> a[f], k=2 -> a[f+1]
        if k == 0:
            return jnp.concatenate([zero_row, a[:fdim - 1, :]], axis=0)
        if k == 2:
            return jnp.concatenate([a[1:, :], zero_row], axis=0)
        return a

    # Fused Conv2d(z) for all mask channels: [mag_mask(3) | real_mask | imag_mask].
    conv = [None] * nout
    for i in range(cz):
        zc = z_ref[0, i]                              # (F, TT)
        for k in range(3):
            t = tap(zc, k)
            for o in range(nout):
                w = wb_ref[(o * cz + i) * 3 + k]      # scalar weight from SMEM
                term = w * t
                conv[o] = term if conv[o] is None else conv[o] + term
    bias0 = nout * cz * 3
    conv = [conv[o] + wb_ref[bias0 + o] for o in range(nout)]

    # |x| and the eye-kernel frequency shift mix weighted by relu(mag_mask)
    mag = jnp.sqrt(xr * xr + xi * xi)
    mag_out = None
    for c in range(MAG_F_DIM):
        term = tap(mag, c) * jnp.maximum(conv[c], 0.0)
        mag_out = term if mag_out is None else mag_out + term

    real_mask = conv[MAG_F_DIM]
    imag_mask = conv[MAG_F_DIM + 1]
    mm = jnp.sqrt(jnp.maximum(real_mask * real_mask + imag_mask * imag_mask,
                              MODULE_EPS))

    cp, sp = _cos_sin_custom_atan2(xi, xr)                              # pha
    cm, sm = _cos_sin_custom_atan2(imag_mask + MODULE_EPS,
                                   real_mask + MODULE_EPS)              # pha_mask

    amp = mag_out * jnp.maximum(mm, 0.0)
    o_ref[0, 0] = amp * (cp * cm - sp * sm)     # amp * cos(pha + pha_mask)
    o_ref[0, 1] = amp * (sp * cm + cp * sm)     # amp * sin(pha + pha_mask)


def mea_forward(x, z, params):
    """x: (B, F, T, 2) f32 (real/imag), z: (B, in_channels, F, T) f32.
    Returns (B, F, T, 2) f32, matching MEA.forward of the PyTorch reference."""
    B, Fr, T, C = x.shape
    assert C == 2, "x last dim must hold (real, imag)"
    Cz = z.shape[1]
    nout = MAG_F_DIM + 2

    # Pack the three conv layers into one flat SMEM weight vector:
    #   weight index (o*Cz + i)*3 + k, biases at the tail.
    W = jnp.concatenate(
        [params["w_mag"].reshape(MAG_F_DIM, Cz, 3),
         params["w_real"].reshape(1, Cz, 3),
         params["w_imag"].reshape(1, Cz, 3)], axis=0).astype(jnp.float32)
    bvec = jnp.concatenate(
        [params["b_mag"], params["b_real"], params["b_imag"]]).astype(jnp.float32)
    wb = jnp.concatenate([W.reshape(-1), bvec])              # (nout*Cz*3 + nout,)

    xk = jnp.moveaxis(x, -1, 1).astype(jnp.float32)          # (B, 2, F, T)
    zk = z.astype(jnp.float32)

    # Tile T (lane dim); keep F whole because the conv needs frequency neighbours.
    TT = T if T <= 512 else 512                              # 512 % 128 == 0
    grid = (B, pl.cdiv(T, TT))

    out = pl.pallas_call(
        _mea_kernel,
        out_shape=jax.ShapeDtypeStruct((B, 2, Fr, T), jnp.float32),
        grid=grid,
        in_specs=[
            pl.BlockSpec(memory_space=pltpu.MemorySpace.SMEM),         # weights
            pl.BlockSpec((1, 2, Fr, TT), lambda b, t: (b, 0, 0, t)),   # x
            pl.BlockSpec((1, Cz, Fr, TT), lambda b, t: (b, 0, 0, t)),  # z
        ],
        out_specs=pl.BlockSpec((1, 2, Fr, TT), lambda b, t: (b, 0, 0, t)),
        compiler_params=pltpu.CompilerParams(
            dimension_semantics=("parallel", "parallel")),
    )(wb, xk, zk)

    return jnp.moveaxis(out, 1, -1)                          # (B, F, T, 2)


# ----------------------- pure-JAX reference (for checking) -----------------------

def _custom_atan2_ref(y, x):
    pi = jnp.float32(np.pi)
    ans = jnp.arctan(y / (x + ATAN_EPS))
    ans = ans + ((y > 0) & (x < 0)).astype(jnp.float32) * pi
    ans = ans - ((y < 0) & (x < 0)).astype(jnp.float32) * pi
    ans = ans * (1.0 - ((y > 0) & (x == 0)).astype(jnp.float32))
    ans = ans + ((y > 0) & (x == 0)).astype(jnp.float32) * (pi / 2)
    ans = ans * (1.0 - ((y < 0) & (x == 0)).astype(jnp.float32))
    ans = ans + ((y < 0) & (x == 0)).astype(jnp.float32) * (-pi / 2)
    return ans


def _mea_reference(x, z, params):
    xr, xi = x[..., 0], x[..., 1]
    mag = jnp.sqrt(xr * xr + xi * xi)
    pha = _custom_atan2_ref(xi, xr)

    def conv_f3(zz, w, b):          # Conv2d(C->O, kernel (3,1), pad (1,0))
        zp = jnp.pad(zz, ((0, 0), (0, 0), (1, 1), (0, 0)))
        Fr = zz.shape[2]
        out = b[None, :, None, None]
        for k in range(3):
            out = out + (w[None, :, :, k, 0, None, None]
                         * zp[:, None, :, k:k + Fr, :]).sum(axis=2)
        return out

    mag_mask = conv_f3(z, params["w_mag"], params["b_mag"])            # (B,3,F,T)
    real_mask = conv_f3(z, params["w_real"], params["b_real"])[:, 0]   # (B,F,T)
    imag_mask = conv_f3(z, params["w_imag"], params["b_imag"])[:, 0]

    magp = jnp.pad(mag, ((0, 0), (1, 1), (0, 0)))
    Fr = mag.shape[1]
    mag_shift = jnp.stack([magp[:, c:c + Fr, :] for c in range(MAG_F_DIM)], 1)
    mag2 = (mag_shift * jnp.maximum(mag_mask, 0.0)).sum(axis=1)

    mm = jnp.sqrt(jnp.maximum(real_mask ** 2 + imag_mask ** 2, MODULE_EPS))
    pm = _custom_atan2_ref(imag_mask + MODULE_EPS, real_mask + MODULE_EPS)
    real = mag2 * jnp.maximum(mm, 0.0) * jnp.cos(pha + pm)
    imag = mag2 * jnp.maximum(mm, 0.0) * jnp.sin(pha + pm)
    return jnp.stack([real, imag], axis=-1)


if __name__ == "__main__":
    key = jax.random.PRNGKey(0)
    kx, kz, k1, k2, k3, k4, k5, k6 = jax.random.split(key, 8)

    B, Cz, Fr, T = 2, 4, 16, 8
    bound = float(1.0 / np.sqrt(Cz * 3))    # ~ PyTorch Conv2d default init bound
    params = {
        "w_mag": jax.random.uniform(k1, (MAG_F_DIM, Cz, 3, 1), jnp.float32, -bound, bound),
        "b_mag": jax.random.uniform(k2, (MAG_F_DIM,), jnp.float32, -bound, bound),
        "w_real": jax.random.uniform(k3, (1, Cz, 3, 1), jnp.float32, -bound, bound),
        "b_real": jax.random.uniform(k4, (1,), jnp.float32, -bound, bound),
        "w_imag": jax.random.uniform(k5, (1, Cz, 3, 1), jnp.float32, -bound, bound),
        "b_imag": jax.random.uniform(k6, (1,), jnp.float32, -bound, bound),
    }
    x = jax.random.normal(kx, (B, Fr, T, 2), jnp.float32)
    z = jax.random.normal(kz, (B, Cz, Fr, T), jnp.float32)

    out = mea_forward(x, z, params)
    jax.block_until_ready(out)
    assert out.shape == (B, Fr, T, 2) and out.dtype == jnp.float32

    ref = _mea_reference(x, z, params)
    max_err = float(jnp.max(jnp.abs(out - ref)))
    assert jnp.allclose(out, ref, rtol=1e-3, atol=1e-3), max_err

    print("KERNEL_OK")
</pallas_src>

<mosaic_0001>
module attributes {stable_mosaic.version = 11 : i64} {
  func.func @_mea_kernel(%arg0: i32, %arg1: i32, %arg2: memref<65xf32, #tpu.memory_space<smem>>, %arg3: memref<1x2x16x8xf32, #tpu.memory_space<vmem>>, %arg4: memref<1x4x16x8xf32, #tpu.memory_space<vmem>>, %arg5: memref<1x2x16x8xf32, #tpu.memory_space<vmem>>) attributes {dimension_semantics = [#tpu.dimension_semantics<parallel>, #tpu.dimension_semantics<parallel>], iteration_bounds = array<i64: 2, 1>, scalar_prefetch = 0 : i64, scratch_operands = 0 : i64, tpu.core_type = #tpu.core_type<tc>, window_params = [{transform_indices = @transform_0, window_bounds = array<i64: 65>}, {transform_indices = @transform_1, window_bounds = array<i64: 1, 2, 16, 8>}, {transform_indices = @transform_2, window_bounds = array<i64: 1, 4, 16, 8>}, {transform_indices = @transform_3, window_bounds = array<i64: 1, 2, 16, 8>}]} {
    %c0 = arith.constant 0 : index
    %c0_0 = arith.constant 0 : index
    %c0_1 = arith.constant 0 : index
    %c0_2 = arith.constant 0 : index
    %0 = vector.load %arg3[%c0, %c0_0, %c0_1, %c0_2] : memref<1x2x16x8xf32, #tpu.memory_space<vmem>>, vector<1x1x16x8xf32>
    %1 = vector.shape_cast %0 : vector<1x1x16x8xf32> to vector<16x8xf32>
    %c0_3 = arith.constant 0 : index
    %c1 = arith.constant 1 : index
    %c0_4 = arith.constant 0 : index
    %c0_5 = arith.constant 0 : index
    %2 = vector.load %arg3[%c0_3, %c1, %c0_4, %c0_5] : memref<1x2x16x8xf32, #tpu.memory_space<vmem>>, vector<1x1x16x8xf32>
    %3 = vector.shape_cast %2 : vector<1x1x16x8xf32> to vector<16x8xf32>
    %cst = arith.constant 0.000000e+00 : f32
    %4 = vector.broadcast %cst : f32 to vector<1x8xf32>
    %c0_6 = arith.constant 0 : index
    %c0_7 = arith.constant 0 : index
    %c0_8 = arith.constant 0 : index
    %c0_9 = arith.constant 0 : index
    %5 = vector.load %arg4[%c0_6, %c0_7, %c0_8, %c0_9] : memref<1x4x16x8xf32, #tpu.memory_space<vmem>>, vector<1x1x16x8xf32>
    %6 = vector.shape_cast %5 : vector<1x1x16x8xf32> to vector<16x8xf32>
    %7 = vector.extract_strided_slice %6 {offsets = [0, 0], sizes = [15, 8], strides = [1, 1]} : vector<16x8xf32> to vector<15x8xf32>
    %8 = tpu.concatenate %4, %7 in 0 : vector<1x8xf32>, vector<15x8xf32> -> vector<16x8xf32>
    %c0_10 = arith.constant 0 : index
    %9 = memref.load %arg2[%c0_10] : memref<65xf32, #tpu.memory_space<smem>>
    %10 = vector.broadcast %9 : f32 to vector<16x8xf32>
    %11 = arith.mulf %10, %8 : vector<16x8xf32>
    %c12 = arith.constant 12 : index
    %12 = memref.load %arg2[%c12] : memref<65xf32, #tpu.memory_space<smem>>
    %13 = vector.broadcast %12 : f32 to vector<16x8xf32>
    %14 = arith.mulf %13, %8 : vector<16x8xf32>
    %c24 = arith.constant 24 : index
    %15 = memref.load %arg2[%c24] : memref<65xf32, #tpu.memory_space<smem>>
    %16 = vector.broadcast %15 : f32 to vector<16x8xf32>
    %17 = arith.mulf %16, %8 : vector<16x8xf32>
    %c36 = arith.constant 36 : index
    %18 = memref.load %arg2[%c36] : memref<65xf32, #tpu.memory_space<smem>>
    %19 = vector.broadcast %18 : f32 to vector<16x8xf32>
    %20 = arith.mulf %19, %8 : vector<16x8xf32>
    %c48 = arith.constant 48 : index
    %21 = memref.load %arg2[%c48] : memref<65xf32, #tpu.memory_space<smem>>
    %22 = vector.broadcast %21 : f32 to vector<16x8xf32>
    %23 = arith.mulf %22, %8 : vector<16x8xf32>
    %c1_11 = arith.constant 1 : index
    %24 = memref.load %arg2[%c1_11] : memref<65xf32, #tpu.memory_space<smem>>
    %25 = vector.broadcast %24 : f32 to vector<16x8xf32>
    %26 = arith.mulf %25, %6 : vector<16x8xf32>
    %27 = arith.addf %11, %26 : vector<16x8xf32>
    %c13 = arith.constant 13 : index
    %28 = memref.load %arg2[%c13] : memref<65xf32, #tpu.memory_space<smem>>
    %29 = vector.broadcast %28 : f32 to vector<16x8xf32>
    %30 = arith.mulf %29, %6 : vector<16x8xf32>
    %31 = arith.addf %14, %30 : vector<16x8xf32>
    %c25 = arith.constant 25 : index
    %32 = memref.load %arg2[%c25] : memref<65xf32, #tpu.memory_space<smem>>
    %33 = vector.broadcast %32 : f32 to vector<16x8xf32>
    %34 = arith.mulf %33, %6 : vector<16x8xf32>
    %35 = arith.addf %17, %34 : vector<16x8xf32>
    %c37 = arith.constant 37 : index
    %36 = memref.load %arg2[%c37] : memref<65xf32, #tpu.memory_space<smem>>
    %37 = vector.broadcast %36 : f32 to vector<16x8xf32>
    %38 = arith.mulf %37, %6 : vector<16x8xf32>
    %39 = arith.addf %20, %38 : vector<16x8xf32>
    %c49 = arith.constant 49 : index
    %40 = memref.load %arg2[%c49] : memref<65xf32, #tpu.memory_space<smem>>
    %41 = vector.broadcast %40 : f32 to vector<16x8xf32>
    %42 = arith.mulf %41, %6 : vector<16x8xf32>
    %43 = arith.addf %23, %42 : vector<16x8xf32>
    %44 = vector.extract_strided_slice %6 {offsets = [1, 0], sizes = [15, 8], strides = [1, 1]} : vector<16x8xf32> to vector<15x8xf32>
    %45 = tpu.concatenate %44, %4 in 0 : vector<15x8xf32>, vector<1x8xf32> -> vector<16x8xf32>
    %c2 = arith.constant 2 : index
    %46 = memref.load %arg2[%c2] : memref<65xf32, #tpu.memory_space<smem>>
    %47 = vector.broadcast %46 : f32 to vector<16x8xf32>
    %48 = arith.mulf %47, %45 : vector<16x8xf32>
    %49 = arith.addf %27, %48 : vector<16x8xf32>
    %c14 = arith.constant 14 : index
    %50 = memref.load %arg2[%c14] : memref<65xf32, #tpu.memory_space<smem>>
    %51 = vector.broadcast %50 : f32 to vector<16x8xf32>
    %52 = arith.mulf %51, %45 : vector<16x8xf32>
    %53 = arith.addf %31, %52 : vector<16x8xf32>
    %c26 = arith.constant 26 : index
    %54 = memref.load %arg2[%c26] : memref<65xf32, #tpu.memory_space<smem>>
    %55 = vector.broadcast %54 : f32 to vector<16x8xf32>
    %56 = arith.mulf %55, %45 : vector<16x8xf32>
    %57 = arith.addf %35, %56 : vector<16x8xf32>
    %c38 = arith.constant 38 : index
    %58 = memref.load %arg2[%c38] : memref<65xf32, #tpu.memory_space<smem>>
    %59 = vector.broadcast %58 : f32 to vector<16x8xf32>
    %60 = arith.mulf %59, %45 : vector<16x8xf32>
    %61 = arith.addf %39, %60 : vector<16x8xf32>
    %c50 = arith.constant 50 : index
    %62 = memref.load %arg2[%c50] : memref<65xf32, #tpu.memory_space<smem>>
    %63 = vector.broadcast %62 : f32 to vector<16x8xf32>
    %64 = arith.mulf %63, %45 : vector<16x8xf32>
    %65 = arith.addf %43, %64 : vector<16x8xf32>
    %c0_12 = arith.constant 0 : index
    %c1_13 = arith.constant 1 : index
    %c0_14 = arith.constant 0 : index
    %c0_15 = arith.constant 0 : index
    %66 = vector.load %arg4[%c0_12, %c1_13, %c0_14, %c0_15] : memref<1x4x16x8xf32, #tpu.memory_space<vmem>>, vector<1x1x16x8xf32>
    %67 = vector.shape_cast %66 : vector<1x1x16x8xf32> to vector<16x8xf32>
    %68 = vector.extract_strided_slice %67 {offsets = [0, 0], sizes = [15, 8], strides = [1, 1]} : vector<16x8xf32> to vector<15x8xf32>
    %69 = tpu.concatenate %4, %68 in 0 : vector<1x8xf32>, vector<15x8xf32> -> vector<16x8xf32>
    %c3 = arith.constant 3 : index
    %70 = memref.load %arg2[%c3] : memref<65xf32, #tpu.memory_space<smem>>
    %71 = vector.broadcast %70 : f32 to vector<16x8xf32>
    %72 = arith.mulf %71, %69 : vector<16x8xf32>
    %73 = arith.addf %49, %72 : vector<16x8xf32>
    %c15 = arith.constant 15 : index
    %74 = memref.load %arg2[%c15] : memref<65xf32, #tpu.memory_space<smem>>
    %75 = vector.broadcast %74 : f32 to vector<16x8xf32>
    %76 = arith.mulf %75, %69 : vector<16x8xf32>
    %77 = arith.addf %53, %76 : vector<16x8xf32>
    %c27 = arith.constant 27 : index
    %78 = memref.load %arg2[%c27] : memref<65xf32, #tpu.memory_space<smem>>
    %79 = vector.broadcast %78 : f32 to vector<16x8xf32>
    %80 = arith.mulf %79, %69 : vector<16x8xf32>
    %81 = arith.addf %57, %80 : vector<16x8xf32>
    %c39 = arith.constant 39 : index
    %82 = memref.load %arg2[%c39] : memref<65xf32, #tpu.memory_space<smem>>
    %83 = vector.broadcast %82 : f32 to vector<16x8xf32>
    %84 = arith.mulf %83, %69 : vector<16x8xf32>
    %85 = arith.addf %61, %84 : vector<16x8xf32>
    %c51 = arith.constant 51 : index
    %86 = memref.load %arg2[%c51] : memref<65xf32, #tpu.memory_space<smem>>
    %87 = vector.broadcast %86 : f32 to vector<16x8xf32>
    %88 = arith.mulf %87, %69 : vector<16x8xf32>
    %89 = arith.addf %65, %88 : vector<16x8xf32>
    %c4 = arith.constant 4 : index
    %90 = memref.load %arg2[%c4] : memref<65xf32, #tpu.memory_space<smem>>
    %91 = vector.broadcast %90 : f32 to vector<16x8xf32>
    %92 = arith.mulf %91, %67 : vector<16x8xf32>
    %93 = arith.addf %73, %92 : vector<16x8xf32>
    %c16 = arith.constant 16 : index
    %94 = memref.load %arg2[%c16] : memref<65xf32, #tpu.memory_space<smem>>
    %95 = vector.broadcast %94 : f32 to vector<16x8xf32>
    %96 = arith.mulf %95, %67 : vector<16x8xf32>
    %97 = arith.addf %77, %96 : vector<16x8xf32>
    %c28 = arith.constant 28 : index
    %98 = memref.load %arg2[%c28] : memref<65xf32, #tpu.memory_space<smem>>
    %99 = vector.broadcast %98 : f32 to vector<16x8xf32>
    %100 = arith.mulf %99, %67 : vector<16x8xf32>
    %101 = arith.addf %81, %100 : vector<16x8xf32>
    %c40 = arith.constant 40 : index
    %102 = memref.load %arg2[%c40] : memref<65xf32, #tpu.memory_space<smem>>
    %103 = vector.broadcast %102 : f32 to vector<16x8xf32>
    %104 = arith.mulf %103, %67 : vector<16x8xf32>
    %105 = arith.addf %85, %104 : vector<16x8xf32>
    %c52 = arith.constant 52 : index
    %106 = memref.load %arg2[%c52] : memref<65xf32, #tpu.memory_space<smem>>
    %107 = vector.broadcast %106 : f32 to vector<16x8xf32>
    %108 = arith.mulf %107, %67 : vector<16x8xf32>
    %109 = arith.addf %89, %108 : vector<16x8xf32>
    %110 = vector.extract_strided_slice %67 {offsets = [1, 0], sizes = [15, 8], strides = [1, 1]} : vector<16x8xf32> to vector<15x8xf32>
    %111 = tpu.concatenate %110, %4 in 0 : vector<15x8xf32>, vector<1x8xf32> -> vector<16x8xf32>
    %c5 = arith.constant 5 : index
    %112 = memref.load %arg2[%c5] : memref<65xf32, #tpu.memory_space<smem>>
    %113 = vector.broadcast %112 : f32 to vector<16x8xf32>
    %114 = arith.mulf %113, %111 : vector<16x8xf32>
    %115 = arith.addf %93, %114 : vector<16x8xf32>
    %c17 = arith.constant 17 : index
    %116 = memref.load %arg2[%c17] : memref<65xf32, #tpu.memory_space<smem>>
    %117 = vector.broadcast %116 : f32 to vector<16x8xf32>
    %118 = arith.mulf %117, %111 : vector<16x8xf32>
    %119 = arith.addf %97, %118 : vector<16x8xf32>
    %c29 = arith.constant 29 : index
    %120 = memref.load %arg2[%c29] : memref<65xf32, #tpu.memory_space<smem>>
    %121 = vector.broadcast %120 : f32 to vector<16x8xf32>
    %122 = arith.mulf %121, %111 : vector<16x8xf32>
    %123 = arith.addf %101, %122 : vector<16x8xf32>
    %c41 = arith.constant 41 : index
    %124 = memref.load %arg2[%c41] : memref<65xf32, #tpu.memory_space<smem>>
    %125 = vector.broadcast %124 : f32 to vector<16x8xf32>
    %126 = arith.mulf %125, %111 : vector<16x8xf32>
    %127 = arith.addf %105, %126 : vector<16x8xf32>
    %c53 = arith.constant 53 : index
    %128 = memref.load %arg2[%c53] : memref<65xf32, #tpu.memory_space<smem>>
    %129 = vector.broadcast %128 : f32 to vector<16x8xf32>
    %130 = arith.mulf %129, %111 : vector<16x8xf32>
    %131 = arith.addf %109, %130 : vector<16x8xf32>
    %c0_16 = arith.constant 0 : index
    %c2_17 = arith.constant 2 : index
    %c0_18 = arith.constant 0 : index
    %c0_19 = arith.constant 0 : index
    %132 = vector.load %arg4[%c0_16, %c2_17, %c0_18, %c0_19] : memref<1x4x16x8xf32, #tpu.memory_space<vmem>>, vector<1x1x16x8xf32>
    %133 = vector.shape_cast %132 : vector<1x1x16x8xf32> to vector<16x8xf32>
    %134 = vector.extract_strided_slice %133 {offsets = [0, 0], sizes = [15, 8], strides = [1, 1]} : vector<16x8xf32> to vector<15x8xf32>
    %135 = tpu.concatenate %4, %134 in 0 : vector<1x8xf32>, vector<15x8xf32> -> vector<16x8xf32>
    %c6 = arith.constant 6 : index
    %136 = memref.load %arg2[%c6] : memref<65xf32, #tpu.memory_space<smem>>
    %137 = vector.broadcast %136 : f32 to vector<16x8xf32>
    %138 = arith.mulf %137, %135 : vector<16x8xf32>
    %139 = arith.addf %115, %138 : vector<16x8xf32>
    %c18 = arith.constant 18 : index
    %140 = memref.load %arg2[%c18] : memref<65xf32, #tpu.memory_space<smem>>
    %141 = vector.broadcast %140 : f32 to vector<16x8xf32>
    %142 = arith.mulf %141, %135 : vector<16x8xf32>
    %143 = arith.addf %119, %142 : vector<16x8xf32>
    %c30 = arith.constant 30 : index
    %144 = memref.load %arg2[%c30] : memref<65xf32, #tpu.memory_space<smem>>
    %145 = vector.broadcast %144 : f32 to vector<16x8xf32>
    %146 = arith.mulf %145, %135 : vector<16x8xf32>
    %147 = arith.addf %123, %146 : vector<16x8xf32>
    %c42 = arith.constant 42 : index
    %148 = memref.load %arg2[%c42] : memref<65xf32, #tpu.memory_space<smem>>
    %149 = vector.broadcast %148 : f32 to vector<16x8xf32>
    %150 = arith.mulf %149, %135 : vector<16x8xf32>
    %151 = arith.addf %127, %150 : vector<16x8xf32>
    %c54 = arith.constant 54 : index
    %152 = memref.load %arg2[%c54] : memref<65xf32, #tpu.memory_space<smem>>
    %153 = vector.broadcast %152 : f32 to vector<16x8xf32>
    %154 = arith.mulf %153, %135 : vector<16x8xf32>
    %155 = arith.addf %131, %154 : vector<16x8xf32>
    %c7 = arith.constant 7 : index
    %156 = memref.load %arg2[%c7] : memref<65xf32, #tpu.memory_space<smem>>
    %157 = vector.broadcast %156 : f32 to vector<16x8xf32>
    %158 = arith.mulf %157, %133 : vector<16x8xf32>
    %159 = arith.addf %139, %158 : vector<16x8xf32>
    %c19 = arith.constant 19 : index
    %160 = memref.load %arg2[%c19] : memref<65xf32, #tpu.memory_space<smem>>
    %161 = vector.broadcast %160 : f32 to vector<16x8xf32>
    %162 = arith.mulf %161, %133 : vector<16x8xf32>
    %163 = arith.addf %143, %162 : vector<16x8xf32>
    %c31 = arith.constant 31 : index
    %164 = memref.load %arg2[%c31] : memref<65xf32, #tpu.memory_space<smem>>
    %165 = vector.broadcast %164 : f32 to vector<16x8xf32>
    %166 = arith.mulf %165, %133 : vector<16x8xf32>
    %167 = arith.addf %147, %166 : vector<16x8xf32>
    %c43 = arith.constant 43 : index
    %168 = memref.load %arg2[%c43] : memref<65xf32, #tpu.memory_space<smem>>
    %169 = vector.broadcast %168 : f32 to vector<16x8xf32>
    %170 = arith.mulf %169, %133 : vector<16x8xf32>
    %171 = arith.addf %151, %170 : vector<16x8xf32>
    %c55 = arith.constant 55 : index
    %172 = memref.load %arg2[%c55] : memref<65xf32, #tpu.memory_space<smem>>
    %173 = vector.broadcast %172 : f32 to vector<16x8xf32>
    %174 = arith.mulf %173, %133 : vector<16x8xf32>
    %175 = arith.addf %155, %174 : vector<16x8xf32>
    %176 = vector.extract_strided_slice %133 {offsets = [1, 0], sizes = [15, 8], strides = [1, 1]} : vector<16x8xf32> to vector<15x8xf32>
    %177 = tpu.concatenate %176, %4 in 0 : vector<15x8xf32>, vector<1x8xf32> -> vector<16x8xf32>
    %c8 = arith.constant 8 : index
    %178 = memref.load %arg2[%c8] : memref<65xf32, #tpu.memory_space<smem>>
    %179 = vector.broadcast %178 : f32 to vector<16x8xf32>
    %180 = arith.mulf %179, %177 : vector<16x8xf32>
    %181 = arith.addf %159, %180 : vector<16x8xf32>
    %c20 = arith.constant 20 : index
    %182 = memref.load %arg2[%c20] : memref<65xf32, #tpu.memory_space<smem>>
    %183 = vector.broadcast %182 : f32 to vector<16x8xf32>
    %184 = arith.mulf %183, %177 : vector<16x8xf32>
    %185 = arith.addf %163, %184 : vector<16x8xf32>
    %c32 = arith.constant 32 : index
    %186 = memref.load %arg2[%c32] : memref<65xf32, #tpu.memory_space<smem>>
    %187 = vector.broadcast %186 : f32 to vector<16x8xf32>
    %188 = arith.mulf %187, %177 : vector<16x8xf32>
    %189 = arith.addf %167, %188 : vector<16x8xf32>
    %c44 = arith.constant 44 : index
    %190 = memref.load %arg2[%c44] : memref<65xf32, #tpu.memory_space<smem>>
    %191 = vector.broadcast %190 : f32 to vector<16x8xf32>
    %192 = arith.mulf %191, %177 : vector<16x8xf32>
    %193 = arith.addf %171, %192 : vector<16x8xf32>
    %c56 = arith.constant 56 : index
    %194 = memref.load %arg2[%c56] : memref<65xf32, #tpu.memory_space<smem>>
    %195 = vector.broadcast %194 : f32 to vector<16x8xf32>
    %196 = arith.mulf %195, %177 : vector<16x8xf32>
    %197 = arith.addf %175, %196 : vector<16x8xf32>
    %c0_20 = arith.constant 0 : index
    %c3_21 = arith.constant 3 : index
    %c0_22 = arith.constant 0 : index
    %c0_23 = arith.constant 0 : index
    %198 = vector.load %arg4[%c0_20, %c3_21, %c0_22, %c0_23] : memref<1x4x16x8xf32, #tpu.memory_space<vmem>>, vector<1x1x16x8xf32>
    %199 = vector.shape_cast %198 : vector<1x1x16x8xf32> to vector<16x8xf32>
    %200 = vector.extract_strided_slice %199 {offsets = [0, 0], sizes = [15, 8], strides = [1, 1]} : vector<16x8xf32> to vector<15x8xf32>
    %201 = tpu.concatenate %4, %200 in 0 : vector<1x8xf32>, vector<15x8xf32> -> vector<16x8xf32>
    %c9 = arith.constant 9 : index
    %202 = memref.load %arg2[%c9] : memref<65xf32, #tpu.memory_space<smem>>
    %203 = vector.broadcast %202 : f32 to vector<16x8xf32>
    %204 = arith.mulf %203, %201 : vector<16x8xf32>
    %205 = arith.addf %181, %204 : vector<16x8xf32>
    %c21 = arith.constant 21 : index
    %206 = memref.load %arg2[%c21] : memref<65xf32, #tpu.memory_space<smem>>
    %207 = vector.broadcast %206 : f32 to vector<16x8xf32>
    %208 = arith.mulf %207, %201 : vector<16x8xf32>
    %209 = arith.addf %185, %208 : vector<16x8xf32>
    %c33 = arith.constant 33 : index
    %210 = memref.load %arg2[%c33] : memref<65xf32, #tpu.memory_space<smem>>
    %211 = vector.broadcast %210 : f32 to vector<16x8xf32>
    %212 = arith.mulf %211, %201 : vector<16x8xf32>
    %213 = arith.addf %189, %212 : vector<16x8xf32>
    %c45 = arith.constant 45 : index
    %214 = memref.load %arg2[%c45] : memref<65xf32, #tpu.memory_space<smem>>
    %215 = vector.broadcast %214 : f32 to vector<16x8xf32>
    %216 = arith.mulf %215, %201 : vector<16x8xf32>
    %217 = arith.addf %193, %216 : vector<16x8xf32>
    %c57 = arith.constant 57 : index
    %218 = memref.load %arg2[%c57] : memref<65xf32, #tpu.memory_space<smem>>
    %219 = vector.broadcast %218 : f32 to vector<16x8xf32>
    %220 = arith.mulf %219, %201 : vector<16x8xf32>
    %221 = arith.addf %197, %220 : vector<16x8xf32>
    %c10 = arith.constant 10 : index
    %222 = memref.load %arg2[%c10] : memref<65xf32, #tpu.memory_space<smem>>
    %223 = vector.broadcast %222 : f32 to vector<16x8xf32>
    %224 = arith.mulf %223, %199 : vector<16x8xf32>
    %225 = arith.addf %205, %224 : vector<16x8xf32>
    %c22 = arith.constant 22 : index
    %226 = memref.load %arg2[%c22] : memref<65xf32, #tpu.memory_space<smem>>
    %227 = vector.broadcast %226 : f32 to vector<16x8xf32>
    %228 = arith.mulf %227, %199 : vector<16x8xf32>
    %229 = arith.addf %209, %228 : vector<16x8xf32>
    %c34 = arith.constant 34 : index
    %230 = memref.load %arg2[%c34] : memref<65xf32, #tpu.memory_space<smem>>
    %231 = vector.broadcast %230 : f32 to vector<16x8xf32>
    %232 = arith.mulf %231, %199 : vector<16x8xf32>
    %233 = arith.addf %213, %232 : vector<16x8xf32>
    %c46 = arith.constant 46 : index
    %234 = memref.load %arg2[%c46] : memref<65xf32, #tpu.memory_space<smem>>
    %235 = vector.broadcast %234 : f32 to vector<16x8xf32>
    %236 = arith.mulf %235, %199 : vector<16x8xf32>
    %237 = arith.addf %217, %236 : vector<16x8xf32>
    %c58 = arith.constant 58 : index
    %238 = memref.load %arg2[%c58] : memref<65xf32, #tpu.memory_space<smem>>
    %239 = vector.broadcast %238 : f32 to vector<16x8xf32>
    %240 = arith.mulf %239, %199 : vector<16x8xf32>
    %241 = arith.addf %221, %240 : vector<16x8xf32>
    %242 = vector.extract_strided_slice %199 {offsets = [1, 0], sizes = [15, 8], strides = [1, 1]} : vector<16x8xf32> to vector<15x8xf32>
    %243 = tpu.concatenate %242, %4 in 0 : vector<15x8xf32>, vector<1x8xf32> -> vector<16x8xf32>
    %c11 = arith.constant 11 : index
    %244 = memref.load %arg2[%c11] : memref<65xf32, #tpu.memory_space<smem>>
    %245 = vector.broadcast %244 : f32 to vector<16x8xf32>
    %246 = arith.mulf %245, %243 : vector<16x8xf32>
    %247 = arith.addf %225, %246 : vector<16x8xf32>
    %c23 = arith.constant 23 : index
    %248 = memref.load %arg2[%c23] : memref<65xf32, #tpu.memory_space<smem>>
    %249 = vector.broadcast %248 : f32 to vector<16x8xf32>
    %250 = arith.mulf %249, %243 : vector<16x8xf32>
    %251 = arith.addf %229, %250 : vector<16x8xf32>
    %c35 = arith.constant 35 : index
    %252 = memref.load %arg2[%c35] : memref<65xf32, #tpu.memory_space<smem>>
    %253 = vector.broadcast %252 : f32 to vector<16x8xf32>
    %254 = arith.mulf %253, %243 : vector<16x8xf32>
    %255 = arith.addf %233, %254 : vector<16x8xf32>
    %c47 = arith.constant 47 : index
    %256 = memref.load %arg2[%c47] : memref<65xf32, #tpu.memory_space<smem>>
    %257 = vector.broadcast %256 : f32 to vector<16x8xf32>
    %258 = arith.mulf %257, %243 : vector<16x8xf32>
    %259 = arith.addf %237, %258 : vector<16x8xf32>
    %c59 = arith.constant 59 : index
    %260 = memref.load %arg2[%c59] : memref<65xf32, #tpu.memory_space<smem>>
    %261 = vector.broadcast %260 : f32 to vector<16x8xf32>
    %262 = arith.mulf %261, %243 : vector<16x8xf32>
    %263 = arith.addf %241, %262 : vector<16x8xf32>
    %c60 = arith.constant 60 : index
    %264 = memref.load %arg2[%c60] : memref<65xf32, #tpu.memory_space<smem>>
    %265 = vector.broadcast %264 : f32 to vector<16x8xf32>
    %266 = arith.addf %247, %265 : vector<16x8xf32>
    %c61 = arith.constant 61 : index
    %267 = memref.load %arg2[%c61] : memref<65xf32, #tpu.memory_space<smem>>
    %268 = vector.broadcast %267 : f32 to vector<16x8xf32>
    %269 = arith.addf %251, %268 : vector<16x8xf32>
    %c62 = arith.constant 62 : index
    %270 = memref.load %arg2[%c62] : memref<65xf32, #tpu.memory_space<smem>>
    %271 = vector.broadcast %270 : f32 to vector<16x8xf32>
    %272 = arith.addf %255, %271 : vector<16x8xf32>
    %c63 = arith.constant 63 : index
    %273 = memref.load %arg2[%c63] : memref<65xf32, #tpu.memory_space<smem>>
    %274 = vector.broadcast %273 : f32 to vector<16x8xf32>
    %275 = arith.addf %259, %274 : vector<16x8xf32>
    %c64 = arith.constant 64 : index
    %276 = memref.load %arg2[%c64] : memref<65xf32, #tpu.memory_space<smem>>
    %277 = vector.broadcast %276 : f32 to vector<16x8xf32>
    %278 = arith.addf %263, %277 : vector<16x8xf32>
    %279 = arith.mulf %1, %1 : vector<16x8xf32>
    %280 = arith.mulf %3, %3 : vector<16x8xf32>
    %281 = arith.addf %279, %280 : vector<16x8xf32>
    %282 = math.sqrt %281 : vector<16x8xf32>
    %283 = vector.extract_strided_slice %282 {offsets = [0, 0], sizes = [15, 8], strides = [1, 1]} : vector<16x8xf32> to vector<15x8xf32>
    %284 = tpu.concatenate %4, %283 in 0 : vector<1x8xf32>, vector<15x8xf32> -> vector<16x8xf32>
    %cst_24 = arith.constant 0.000000e+00 : f32
    %285 = vector.broadcast %cst_24 : f32 to vector<16x8xf32>
    %286 = arith.maximumf %266, %285 : vector<16x8xf32>
    %287 = arith.mulf %284, %286 : vector<16x8xf32>
    %cst_25 = arith.constant 0.000000e+00 : f32
    %288 = vector.broadcast %cst_25 : f32 to vector<16x8xf32>
    %289 = arith.maximumf %269, %288 : vector<16x8xf32>
    %290 = arith.mulf %282, %289 : vector<16x8xf32>
    %291 = arith.addf %287, %290 : vector<16x8xf32>
    %292 = vector.extract_strided_slice %282 {offsets = [1, 0], sizes = [15, 8], strides = [1, 1]} : vector<16x8xf32> to vector<15x8xf32>
    %293 = tpu.concatenate %292, %4 in 0 : vector<15x8xf32>, vector<1x8xf32> -> vector<16x8xf32>
    %cst_26 = arith.constant 0.000000e+00 : f32
    %294 = vector.broadcast %cst_26 : f32 to vector<16x8xf32>
    %295 = arith.maximumf %272, %294 : vector<16x8xf32>
    %296 = arith.mulf %293, %295 : vector<16x8xf32>
    %297 = arith.addf %291, %296 : vector<16x8xf32>
    %298 = arith.mulf %275, %275 : vector<16x8xf32>
    %299 = arith.mulf %278, %278 : vector<16x8xf32>
    %300 = arith.addf %298, %299 : vector<16x8xf32>
    %cst_27 = arith.constant 9.99999996E-13 : f32
    %301 = vector.broadcast %cst_27 : f32 to vector<16x8xf32>
    %302 = arith.maximumf %300, %301 : vector<16x8xf32>
    %303 = math.sqrt %302 : vector<16x8xf32>
    %cst_28 = arith.constant 9.99999997E-7 : f32
    %304 = vector.broadcast %cst_28 : f32 to vector<16x8xf32>
    %305 = arith.addf %1, %304 : vector<16x8xf32>
    %306 = arith.divf %3, %305 : vector<16x8xf32>
    %cst_29 = arith.constant -9.99999984E+17 : f32
    %cst_30 = arith.constant 9.99999984E+17 : f32
    %307 = vector.broadcast %cst_29 : f32 to vector<16x8xf32>
    %308 = arith.maximumf %307, %306 : vector<16x8xf32>
    %309 = vector.broadcast %cst_30 : f32 to vector<16x8xf32>
    %310 = arith.minimumf %309, %308 : vector<16x8xf32>
    %311 = arith.mulf %310, %310 : vector<16x8xf32>
    %cst_31 = arith.constant 1.000000e+00 : f32
    %312 = vector.broadcast %cst_31 : f32 to vector<16x8xf32>
    %313 = arith.addf %312, %311 : vector<16x8xf32>
    %314 = math.rsqrt %313 : vector<16x8xf32>
    %315 = arith.mulf %310, %314 : vector<16x8xf32>
    %cst_32 = arith.constant 0.000000e+00 : f32
    %316 = vector.broadcast %cst_32 : f32 to vector<16x8xf32>
    %317 = arith.cmpf olt, %1, %316 : vector<16x8xf32>
    %cst_33 = arith.constant 0.000000e+00 : f32
    %318 = vector.broadcast %cst_33 : f32 to vector<16x8xf32>
    %319 = arith.cmpf one, %3, %318 : vector<16x8xf32>
    %320 = arith.andi %317, %319 : vector<16x8xi1>
    %cst_34 = arith.constant 0.000000e+00 : f32
    %321 = vector.broadcast %cst_34 : f32 to vector<16x8xf32>
    %322 = arith.subf %321, %314 : vector<16x8xf32>
    %323 = arith.select %320, %322, %314 : vector<16x8xi1>, vector<16x8xf32>
    %cst_35 = arith.constant 0.000000e+00 : f32
    %324 = vector.broadcast %cst_35 : f32 to vector<16x8xf32>
    %325 = arith.subf %324, %315 : vector<16x8xf32>
    %326 = arith.select %320, %325, %315 : vector<16x8xi1>, vector<16x8xf32>
    %cst_36 = arith.constant 0.000000e+00 : f32
    %327 = vector.broadcast %cst_36 : f32 to vector<16x8xf32>
    %328 = arith.cmpf oeq, %1, %327 : vector<16x8xf32>
    %cst_37 = arith.constant 0.000000e+00 : f32
    %329 = vector.broadcast %cst_37 : f32 to vector<16x8xf32>
    %330 = arith.cmpf ogt, %3, %329 : vector<16x8xf32>
    %331 = arith.andi %328, %330 : vector<16x8xi1>
    %cst_38 = arith.constant 0.000000e+00 : f32
    %332 = vector.broadcast %cst_38 : f32 to vector<16x8xf32>
    %333 = arith.cmpf olt, %3, %332 : vector<16x8xf32>
    %334 = arith.andi %328, %333 : vector<16x8xi1>
    %335 = arith.ori %331, %334 : vector<16x8xi1>
    %cst_39 = arith.constant 0.000000e+00 : f32
    %336 = vector.broadcast %cst_39 : f32 to vector<16x8xf32>
    %337 = arith.select %335, %336, %323 : vector<16x8xi1>, vector<16x8xf32>
    %cst_40 = arith.constant 1.000000e+00 : f32
    %338 = vector.broadcast %cst_40 : f32 to vector<16x8xf32>
    %339 = arith.select %331, %338, %326 : vector<16x8xi1>, vector<16x8xf32>
    %cst_41 = arith.constant -1.000000e+00 : f32
    %340 = vector.broadcast %cst_41 : f32 to vector<16x8xf32>
    %341 = arith.select %334, %340, %339 : vector<16x8xi1>, vector<16x8xf32>
    %cst_42 = arith.constant 9.99999996E-13 : f32
    %342 = vector.broadcast %cst_42 : f32 to vector<16x8xf32>
    %343 = arith.addf %278, %342 : vector<16x8xf32>
    %cst_43 = arith.constant 9.99999996E-13 : f32
    %344 = vector.broadcast %cst_43 : f32 to vector<16x8xf32>
    %345 = arith.addf %275, %344 : vector<16x8xf32>
    %cst_44 = arith.constant 9.99999997E-7 : f32
    %346 = vector.broadcast %cst_44 : f32 to vector<16x8xf32>
    %347 = arith.addf %345, %346 : vector<16x8xf32>
    %348 = arith.divf %343, %347 : vector<16x8xf32>
    %cst_45 = arith.constant -9.99999984E+17 : f32
    %cst_46 = arith.constant 9.99999984E+17 : f32
    %349 = vector.broadcast %cst_45 : f32 to vector<16x8xf32>
    %350 = arith.maximumf %349, %348 : vector<16x8xf32>
    %351 = vector.broadcast %cst_46 : f32 to vector<16x8xf32>
    %352 = arith.minimumf %351, %350 : vector<16x8xf32>
    %353 = arith.mulf %352, %352 : vector<16x8xf32>
    %cst_47 = arith.constant 1.000000e+00 : f32
    %354 = vector.broadcast %cst_47 : f32 to vector<16x8xf32>
    %355 = arith.addf %354, %353 : vector<16x8xf32>
    %356 = math.rsqrt %355 : vector<16x8xf32>
    %357 = arith.mulf %352, %356 : vector<16x8xf32>
    %cst_48 = arith.constant 0.000000e+00 : f32
    %358 = vector.broadcast %cst_48 : f32 to vector<16x8xf32>
    %359 = arith.cmpf olt, %345, %358 : vector<16x8xf32>
    %cst_49 = arith.constant 0.000000e+00 : f32
    %360 = vector.broadcast %cst_49 : f32 to vector<16x8xf32>
    %361 = arith.cmpf one, %343, %360 : vector<16x8xf32>
    %362 = arith.andi %359, %361 : vector<16x8xi1>
    %cst_50 = arith.constant 0.000000e+00 : f32
    %363 = vector.broadcast %cst_50 : f32 to vector<16x8xf32>
    %364 = arith.subf %363, %356 : vector<16x8xf32>
    %365 = arith.select %362, %364, %356 : vector<16x8xi1>, vector<16x8xf32>
    %cst_51 = arith.constant 0.000000e+00 : f32
    %366 = vector.broadcast %cst_51 : f32 to vector<16x8xf32>
    %367 = arith.subf %366, %357 : vector<16x8xf32>
    %368 = arith.select %362, %367, %357 : vector<16x8xi1>, vector<16x8xf32>
    %cst_52 = arith.constant 0.000000e+00 : f32
    %369 = vector.broadcast %cst_52 : f32 to vector<16x8xf32>
    %370 = arith.cmpf oeq, %345, %369 : vector<16x8xf32>
    %cst_53 = arith.constant 0.000000e+00 : f32
    %371 = vector.broadcast %cst_53 : f32 to vector<16x8xf32>
    %372 = arith.cmpf ogt, %343, %371 : vector<16x8xf32>
    %373 = arith.andi %370, %372 : vector<16x8xi1>
    %cst_54 = arith.constant 0.000000e+00 : f32
    %374 = vector.broadcast %cst_54 : f32 to vector<16x8xf32>
    %375 = arith.cmpf olt, %343, %374 : vector<16x8xf32>
    %376 = arith.andi %370, %375 : vector<16x8xi1>
    %377 = arith.ori %373, %376 : vector<16x8xi1>
    %cst_55 = arith.constant 0.000000e+00 : f32
    %378 = vector.broadcast %cst_55 : f32 to vector<16x8xf32>
    %379 = arith.select %377, %378, %365 : vector<16x8xi1>, vector<16x8xf32>
    %cst_56 = arith.constant 1.000000e+00 : f32
    %380 = vector.broadcast %cst_56 : f32 to vector<16x8xf32>
    %381 = arith.select %373, %380, %368 : vector<16x8xi1>, vector<16x8xf32>
    %cst_57 = arith.constant -1.000000e+00 : f32
    %382 = vector.broadcast %cst_57 : f32 to vector<16x8xf32>
    %383 = arith.select %376, %382, %381 : vector<16x8xi1>, vector<16x8xf32>
    %cst_58 = arith.constant 0.000000e+00 : f32
    %384 = vector.broadcast %cst_58 : f32 to vector<16x8xf32>
    %385 = arith.maximumf %303, %384 : vector<16x8xf32>
    %386 = arith.mulf %297, %385 : vector<16x8xf32>
    %387 = arith.mulf %337, %379 : vector<16x8xf32>
    %388 = arith.mulf %341, %383 : vector<16x8xf32>
    %389 = arith.subf %387, %388 : vector<16x8xf32>
    %390 = arith.mulf %386, %389 : vector<16x8xf32>
    %c0_59 = arith.constant 0 : index
    %c0_60 = arith.constant 0 : index
    %c0_61 = arith.constant 0 : index
    %c0_62 = arith.constant 0 : index
    %391 = vector.load %arg5[%c0_59, %c0_60, %c0_61, %c0_62] : memref<1x2x16x8xf32, #tpu.memory_space<vmem>>, vector<1x1x16x8xf32>
    %392 = vector.shape_cast %391 : vector<1x1x16x8xf32> to vector<16x8xf32>
    %393 = vector.shape_cast %390 : vector<16x8xf32> to vector<1x1x16x8xf32>
    tpu.vector_store %arg5[%c0_59, %c0_60, %c0_61, %c0_62], %393 {strides = array<i32>} : memref<1x2x16x8xf32, #tpu.memory_space<vmem>>, vector<1x1x16x8xf32>,
    %394 = arith.mulf %341, %379 : vector<16x8xf32>
    %395 = arith.mulf %337, %383 : vector<16x8xf32>
    %396 = arith.addf %394, %395 : vector<16x8xf32>
    %397 = arith.mulf %386, %396 : vector<16x8xf32>
    %c0_63 = arith.constant 0 : index
    %c1_64 = arith.constant 1 : index
    %c0_65 = arith.constant 0 : index
    %c0_66 = arith.constant 0 : index
    %398 = vector.load %arg5[%c0_63, %c1_64, %c0_65, %c0_66] : memref<1x2x16x8xf32, #tpu.memory_space<vmem>>, vector<1x1x16x8xf32>
    %399 = vector.shape_cast %398 : vector<1x1x16x8xf32> to vector<16x8xf32>
    %400 = vector.shape_cast %397 : vector<16x8xf32> to vector<1x1x16x8xf32>
    tpu.vector_store %arg5[%c0_63, %c1_64, %c0_65, %c0_66], %400 {strides = array<i32>} : memref<1x2x16x8xf32, #tpu.memory_space<vmem>>, vector<1x1x16x8xf32>,
    return
  }
  func.func @transform_0(%arg0: i32, %arg1: i32) -> i32 {
    %c0_i32 = arith.constant 0 : i32
    %c0_i32_0 = arith.constant 0 : i32
    return %c0_i32 : i32
  }
  func.func @transform_1(%arg0: i32, %arg1: i32) -> (i32, i32, i32, i32) {
    %c0_i32 = arith.constant 0 : i32
    %c0_i32_0 = arith.constant 0 : i32
    %c0_i32_1 = arith.constant 0 : i32
    return %arg0, %c0_i32, %c0_i32_0, %arg1 : i32, i32, i32, i32
  }
  func.func @transform_2(%arg0: i32, %arg1: i32) -> (i32, i32, i32, i32) {
    %c0_i32 = arith.constant 0 : i32
    %c0_i32_0 = arith.constant 0 : i32
    %c0_i32_1 = arith.constant 0 : i32
    return %arg0, %c0_i32, %c0_i32_0, %arg1 : i32, i32, i32, i32
  }
  func.func @transform_3(%arg0: i32, %arg1: i32) -> (i32, i32, i32, i32) {
    %c0_i32 = arith.constant 0 : i32
    %c0_i32_0 = arith.constant 0 : i32
    %c0_i32_1 = arith.constant 0 : i32
    return %arg0, %c0_i32, %c0_i32_0, %arg1 : i32, i32, i32, i32
  }
}

</mosaic_0001>

<bundles_post_ra>
// kernel: tpu_custom_call.1
= control target key start
LH: loop header
LB: loop body
LE: loop exit
PB: predicated region body
PF: predicated region fallthrough
CT: control target
= control target key end

     0   :  { %8 = vsyncpa [#allocation3], 0  ;;  %s1226_s12 = smov 0   ;;  %s1228_s13 = smov 0   ;;  %s1895_s0 = inlined_call_operand.vmem [shape: f32[65], index: 0, kind: input, shape index: {}]   ;;  %s1896_s1 = inlined_call_operand.vmem [shape: f32[2,2,16,8], index: 1, kind: input, shape index: {}]   ;;  %s1897_s2 = inlined_call_operand.vmem [shape: f32[2,4,16,8], index: 2, kind: input, shape index: {}]   ;;  %s1898_s3 = inlined_call_operand.vmem [shape: f32[2,2,16,8], index: 3, kind: output, shape index: {}]  }
   0x1   :  { %s1230_s14 = smov 0  }
   0x2 LB: > { %s1007_s15 = sadd.s32 4294967295, %s1203_s14   ;;  %s26_s16 = sadd.s32 1, %s1199_s13  ;;  %s1203_s14 = sphi %s1230_s14, %s14_s14   ;;  %s1199_s13 = sphi %s1228_s13, %s1932_s13   ;;  %s1195_s12 = sphi %s1226_s12, %s1931_s12  }
   0x3   : > { %p28_p0 = scmp.ge.s32.totalorder %s26_s16, 2  ;;  %p1009_p1 = scmp.ge.s32.totalorder %s1203_s14, 1 }
   0x4   : > { %p136_p2 = scmp.lt.s32.totalorder %s1203_s14, 3  ;;  %p1251_p4 = scmp.eq.s32.totalorder %s1007_s15, 0 }
   0x5   : > { %s1934_s16 = smov (%p28_p0, %s26_s16), 0  ;;  %s149_s21 = sshll.u32 %s1895_s0, 4  ;;  %s150_s21 = int_to_ptr.vmem [resolvable:$true] %s149_s21 }
   0x6   : > { %p1247_p3 = pnand %p1009_p1, %p136_p2  ;;  %s1162_s22 = scalar_lea.vmem %s150_s21, 16 }
   0x7   : > { %p1163_p7 = scmp.ne.s32.totalorder %s150_s21, %s1162_s22  ;;  %p1170_p11 = scmp.lt.s32.totalorder %s150_s21, %s150_s21 }
   0x8   : > { %p1107_p5 = pneg %p1247_p3  ;;  %p1171_p12 = scmp.lt.s32.totalorder %s1162_s22, %s1162_s22 }
   0xa   : > { %p1108_p6 = pnand %p1251_p4, %p1107_p5  ;;  %p1172_p13 = por %p1171_p12, %p1170_p11 }
   0xc   : > { %p1164_p8 = pneg %p1108_p6 }
   0xe   : > { %p1165_p9 = pnand %p1164_p8, %p1163_p7 }
  0x10   : > { %p1166_p10 = pneg %p1165_p9 }
  0x12   : > { %p1173_p0 = pnand %p1172_p13, %p1166_p10 }
  0x14   : > { %1176 = shalt.err (!%p1173_p0)
}
  0x15   : > { %s1205_s23 = smov [#allocation2]   ;;  %184 = sbr.rel (%p1247_p3) target bundleno = 169 (0xa9), region = 32 }
  0x16   : > { %1110 = dma.vmem_to_smem (!%p1108_p6), %s150_s21, 16, %s1205_s23, [#allocation3]  }
  0x1c   : > { %1190 = dma.done.wait (%p1251_p4), [#allocation3], 16  }
  0x1d   : > { %1192 = vsyncadd (%p1251_p4), [#allocation3], 4294967280 }
  0x1e   : > { %190 = sfence }
  0x1f   : > { %p223_p1 = scmp.lt.s32.totalorder %s1195_s12, 1  ;;  %s1273_s25 = sld [smem:[#allocation2]]  ;;  %vm256_vm0 = vcmask 1040384   ;;  %vm313_vm1 = vcmask 1046528  }
  0x20   : > { %s1276_s27 = sld [smem:[#allocation2 + $0xc]]  ;;  %s1283_s4 = sld [smem:[#allocation2 + $0x18]] }
  0x21   : > { %s1936_s12 = smov (!%p223_p1, %s1195_s12), 1  ;;  %s1285_s5 = sld [smem:[#allocation2 + $0x24]] }
  0x22   : > { %s1101_s24 = sshll.u32 %s1936_s12, 6  ;;  %s1100_s26 = sshll.u32 %s1936_s12, 5 }
  0x23   : > { %s1281_s30 = scalar_lea.vmem %s1897_s2, %s1101_s24  ;;  %s1287_s6 = sld [smem:[#allocation2 + $0x30]] }
  0x24   : > { %s230_s9 = scalar_lea.vmem %s1896_s1, %s1100_s26  ;;  %s1294_s10 = sld [smem:[#allocation2 + $0x1]]  ;;  %v1297_v0 = vld [vmem:[%s1281_s30] sm:$0xff]  ;;  %v1304_v3 = vld [vmem:[%s1281_s30 + $0x8] sm:$0xff]  ;;  %v1375_v57 = vld [vmem:[%s1281_s30 + $0x10] sm:$0xff] }
  0x25   : > { %v1299_v1 = vld [vmem:[%s230_s9 + $0x10] sm:$0xff]  ;;  %v1301_v2 = vld [vmem:[%s230_s9 + $0x18] sm:$0xff]  ;;  %s1306_s11 = sld [smem:[#allocation2 + $0xd]]  ;;  %v1308_v4 = vld [vmem:[%s230_s9] sm:$0xff]  ;;  %s1310_s15 = sld [smem:[#allocation2 + $0x19]]  ;;  %v257_v6 = vrot.slane %v1297_v0, 7  ;;  %v264_v12 = vstv %s1273_s25 }
  0x26   : > { %s1312_s17 = sld [smem:[#allocation2 + $0x25]]  ;;  %v1314_v5 = vld [vmem:[%s230_s9 + $0x8] sm:$0xff]  ;;  %v691_v7 = vmul.f32 %v1308_v4, %v1308_v4  ;;  %v258_v8 = vrot.slane %v1304_v3, 7  ;;  %s1320_s18 = sld [smem:[#allocation2 + $0x31]]  ;;  %v693_v10 = vmul.f32 %v1299_v1, %v1299_v1  ;;  %v694_v11 = vmul.f32 %v1301_v2, %v1301_v2  ;;  %v1378_v58 = vld [vmem:[%s1281_s30 + $0x18] sm:$0xff] }
  0x27   : > { %v692_v9 = vmul.f32 %v1314_v5, %v1314_v5  ;;  %s1329_s19 = sld [smem:[#allocation2 + $0x2]]  ;;  %v268_v13 = vstv %s1276_s27  ;;  %v272_v14 = vstv %s1283_s4  ;;  %v276_v15 = vstv %s1285_s5  ;;  %s1339_s20 = sld [smem:[#allocation2 + $0xe]] }
  0x28   : > { %v262_v17 = vsel %vm256_vm0, 0.0, %v257_v6  ;;  %v314_v19 = vrot.slane %v1297_v0, 1  ;;  %v315_v20 = vrot.slane %v1304_v3, 1  ;;  %v259_v21 = vsel %vm256_vm0, %v257_v6, %v258_v8  ;;  %s1351_s21 = sld [smem:[#allocation2 + $0x1a]]  ;;  %s1353_s22 = sld [smem:[#allocation2 + $0x26]] }
  0x29   : > { %v280_v16 = vstv %s1287_s6  ;;  %v265_v22 = vmul.f32 %v264_v12, %v262_v17  ;;  %v1342_v23 = vadd.f32 %v693_v10, %v691_v7  ;;  %v1344_v24 = vadd.f32 %v694_v11, %v692_v9  ;;  %s1358_s23 = sld [smem:[#allocation2 + $0x32]]  ;;  %s1364_s24 = sld [smem:[#allocation2 + $0x3]] }
  0x2a   : > { %v284_v18 = vstv %s1294_s10  ;;  %v266_v25 = vmul.f32 %v264_v12, %v259_v21  ;;  %v269_v26 = vmul.f32 %v268_v13, %v262_v17  ;;  %v270_v27 = vmul.f32 %v268_v13, %v259_v21  ;;  %s1367_s25 = sld [smem:[#allocation2 + $0xf]]  ;;  %s1380_s27 = sld [smem:[#allocation2 + $0x1b]] }
  0x2b   : > { %v290_v28 = vstv %s1306_s11  ;;  %v285_v29 = vmul.f32 %v284_v18, %v1297_v0  ;;  %v286_v30 = vmul.f32 %v284_v18, %v1304_v3  ;;  %v296_v31 = vstv %s1310_s15  ;;  %s1382_s28 = sld [smem:[#allocation2 + $0x27]]  ;;  %s1386_s29 = sld [smem:[#allocation2 + $0x33]] }
  0x2c   : > { %v302_v32 = vstv %s1312_s17  ;;  %v273_v33 = vmul.f32 %v272_v14, %v262_v17  ;;  %v274_v34 = vmul.f32 %v272_v14, %v259_v21  ;;  %v277_v35 = vmul.f32 %v276_v15, %v262_v17  ;;  %s1388_s4 = sld [smem:[#allocation2 + $0x4]]  ;;  %s1394_s5 = sld [smem:[#allocation2 + $0x10]] }
  0x2d   : > { %v278_v36 = vmul.f32 %v276_v15, %v259_v21  ;;  %v281_v37 = vmul.f32 %v280_v16, %v262_v17  ;;  %v291_v38 = vmul.f32 %v290_v28, %v1297_v0  ;;  %v292_v39 = vmul.f32 %v290_v28, %v1304_v3  ;;  %s1397_s6 = sld [smem:[#allocation2 + $0x1c]]  ;;  %s1403_s7 = sld [smem:[#allocation2 + $0x28]] }
  0x2e   : > { %v308_v40 = vstv %s1320_s18  ;;  %v297_v41 = vmul.f32 %v296_v31, %v1297_v0  ;;  %v298_v42 = vmul.f32 %v296_v31, %v1304_v3  ;;  %v303_v43 = vmul.f32 %v302_v32, %v1297_v0  ;;  %s1405_s8 = sld [smem:[#allocation2 + $0x34]]  ;;  %s1409_s9 = sld [smem:[#allocation2 + $0x5]] }
  0x2f   : > { %v321_v44 = vstv %s1329_s19  ;;  %v282_v45 = vmul.f32 %v280_v16, %v259_v21  ;;  %v287_v46 = vadd.f32 %v285_v29, %v265_v22  ;;  %v288_v47 = vadd.f32 %v286_v30, %v266_v25  ;;  %s1411_s10 = sld [smem:[#allocation2 + $0x11]]  ;;  %s1417_s11 = sld [smem:[#allocation2 + $0x1d]] }
  0x30   : > { %v316_v48 = vsel %vm313_vm1, %v314_v19, %v315_v20  ;;  %v304_v49 = vmul.f32 %v302_v32, %v1304_v3  ;;  %v309_v50 = vmul.f32 %v308_v40, %v1297_v0  ;;  %v319_v51 = vsel %vm313_vm1, %v315_v20, 0.0  ;;  %s1419_s15 = sld [smem:[#allocation2 + $0x29]]  ;;  %s1425_s17 = sld [smem:[#allocation2 + $0x35]] }
  0x31   : > { %v327_v52 = vstv %s1339_s20  ;;  %v293_v53 = vadd.f32 %v291_v38, %v269_v26  ;;  %v310_v54 = vmul.f32 %v308_v40, %v1304_v3  ;;  %v322_v55 = vmul.f32 %v321_v44, %v316_v48  ;;  %s1431_s18 = sld [smem:[#allocation2 + $0x6]]  ;;  %s1437_s19 = sld [smem:[#allocation2 + $0x12]] }
  0x32   : > { %v323_v56 = vmul.f32 %v321_v44, %v319_v51  ;;  %v294_v59 = vadd.f32 %v292_v39, %v270_v27  ;;  %v299_v60 = vadd.f32 %v297_v41, %v273_v33  ;;  %v300_v61 = vadd.f32 %v298_v42, %v274_v34  ;;  %s1444_s20 = sld [smem:[#allocation2 + $0x1e]] }
  0x33   : > { %v305_v62 = vadd.f32 %v303_v43, %v277_v35  ;;  %v328_v63 = vmul.f32 %v327_v52, %v316_v48  ;;  %v329_v0 = vmul.f32 %v327_v52, %v319_v51  ;;  %v333_v6 = vstv %s1351_s21  ;;  %s1453_s21 = sld [smem:[#allocation2 + $0x2a]] }
  0x34   : > { %v339_v3 = vstv %s1353_s22  ;;  %v306_v7 = vadd.f32 %v304_v49, %v278_v36  ;;  %v311_v8 = vadd.f32 %v309_v50, %v281_v37  ;;  %v355_v9 = vrot.slane %v1375_v57, 7  ;;  %s1455_s22 = sld [smem:[#allocation2 + $0x36]] }
  0x35   : > { %v356_v10 = vrot.slane %v1378_v58, 7  ;;  %v312_v11 = vadd.f32 %v310_v54, %v282_v45  ;;  %v324_v12 = vadd.f32 %v322_v55, %v287_v46  ;;  %v325_v13 = vadd.f32 %v323_v56, %v288_v47 }
  0x36   : > { %v345_v14 = vstv %s1358_s23  ;;  %v334_v15 = vmul.f32 %v333_v6, %v316_v48  ;;  %v335_v16 = vmul.f32 %v333_v6, %v319_v51  ;;  %v340_v17 = vmul.f32 %v339_v3, %v316_v48  ;;  %s1460_s23 = sld [smem:[#allocation2 + $0x7]] }
  0x37   : > { %v362_v18 = vstv %s1364_s24  ;;  %v330_v19 = vadd.f32 %v328_v63, %v293_v53  ;;  %v331_v20 = vadd.f32 %v329_v0, %v294_v59  ;;  %v341_v21 = vmul.f32 %v339_v3, %v319_v51  ;;  %s1463_s24 = sld [smem:[#allocation2 + $0x13]] }
  0x38   : > { %v368_v22 = vstv %s1367_s25  ;;  %v346_v25 = vmul.f32 %v345_v14, %v316_v48  ;;  %v347_v26 = vmul.f32 %v345_v14, %v319_v51  ;;  %v357_v27 = vsel %vm256_vm0, %v355_v9, %v356_v10  ;;  %s1465_s25 = sld [smem:[#allocation2 + $0x1f]] }
  0x39   : > { %v360_v28 = vsel %vm256_vm0, 0.0, %v355_v9  ;;  %v364_v30 = vmul.f32 %v362_v18, %v357_v27  ;;  %v374_v31 = vstv %s1380_s27  ;;  %v380_v32 = vstv %s1382_s28  ;;  %s1470_s27 = sld [smem:[#allocation2 + $0x2b]]  ;;  %s1475_s28 = sld [smem:[#allocation2 + $0x37]] }
  0x3a   : > { %v363_v29 = vmul.f32 %v362_v18, %v360_v28  ;;  %v336_v33 = vadd.f32 %v334_v15, %v299_v60  ;;  %v337_v34 = vadd.f32 %v335_v16, %v300_v61  ;;  %v369_v35 = vmul.f32 %v368_v22, %v360_v28 }
  0x3b   : > { %v370_v36 = vmul.f32 %v368_v22, %v357_v27  ;;  %v342_v37 = vadd.f32 %v340_v17, %v305_v62  ;;  %v343_v38 = vadd.f32 %v341_v21, %v306_v7  ;;  %v386_v39 = vstv %s1386_s29  ;;  %s1478_s29 = sld [smem:[#allocation2 + $0x8]] }
  0x3c   : > { %v392_v40 = vstv %s1388_s4  ;;  %v375_v41 = vmul.f32 %v374_v31, %v360_v28  ;;  %v376_v42 = vmul.f32 %v374_v31, %v357_v27  ;;  %v381_v43 = vmul.f32 %v380_v32, %v360_v28  ;;  %s1481_s4 = sld [smem:[#allocation2 + $0x14]] }
  0x3d   : > { %v382_v44 = vmul.f32 %v380_v32, %v357_v27  ;;  %v348_v45 = vadd.f32 %v346_v25, %v311_v8  ;;  %v349_v46 = vadd.f32 %v347_v26, %v312_v11  ;;  %v365_v47 = vadd.f32 %v363_v29, %v324_v12  ;;  %v1442_v25 = vld [vmem:[%s1281_s30 + $0x20] sm:$0xff]  ;;  %v1449_v29 = vld [vmem:[%s1281_s30 + $0x28] sm:$0xff] }
  0x3e   : > { %v366_v48 = vadd.f32 %v364_v30, %v325_v13  ;;  %v371_v49 = vadd.f32 %v369_v35, %v330_v19  ;;  %v372_v50 = vadd.f32 %v370_v36, %v331_v20  ;;  %v387_v51 = vmul.f32 %v386_v39, %v360_v28 }
  0x3f   : > { %v398_v52 = vstv %s1394_s5  ;;  %v388_v53 = vmul.f32 %v386_v39, %v357_v27  ;;  %v393_v54 = vmul.f32 %v1375_v57, %v392_v40  ;;  %v394_v55 = vmul.f32 %v1378_v58, %v392_v40  ;;  %s1484_s5 = sld [smem:[#allocation2 + $0x2c]] }
  0x40   : > { %v404_v56 = vstv %s1397_s6  ;;  %v377_v59 = vadd.f32 %v375_v41, %v336_v33  ;;  %v378_v60 = vadd.f32 %v376_v42, %v337_v34  ;;  %v383_v61 = vadd.f32 %v381_v43, %v342_v37  ;;  %s1491_s6 = sld [smem:[#allocation2 + $0x20]] }
  0x41   : > { %v384_v62 = vadd.f32 %v382_v44, %v343_v38  ;;  %v399_v63 = vmul.f32 %v1375_v57, %v398_v52  ;;  %v400_v0 = vmul.f32 %v1378_v58, %v398_v52  ;;  %v410_v6 = vstv %s1403_s7  ;;  %s1494_s7 = sld [smem:[#allocation2 + $0x38]] }
  0x42   : > { %v416_v3 = vstv %s1405_s8  ;;  %v405_v7 = vmul.f32 %v1375_v57, %v404_v56  ;;  %v406_v8 = vmul.f32 %v1378_v58, %v404_v56  ;;  %v421_v9 = vrot.slane %v1375_v57, 1  ;;  %s1499_s8 = sld [smem:[#allocation2 + $0x2d]] }
  0x43   : > { %v422_v10 = vrot.slane %v1378_v58, 1  ;;  %v389_v11 = vadd.f32 %v387_v51, %v348_v45  ;;  %v390_v12 = vadd.f32 %v388_v53, %v349_v46  ;;  %v395_v13 = vadd.f32 %v393_v54, %v365_v47 }
  0x44   : > { %v396_v14 = vadd.f32 %v394_v55, %v366_v48  ;;  %v411_v15 = vmul.f32 %v1375_v57, %v410_v6  ;;  %v412_v16 = vmul.f32 %v1378_v58, %v410_v6  ;;  %v417_v17 = vmul.f32 %v1375_v57, %v416_v3 }
  0x45   : > { %v428_v18 = vstv %s1409_s9  ;;  %v401_v19 = vadd.f32 %v399_v63, %v371_v49  ;;  %v402_v20 = vadd.f32 %v400_v0, %v372_v50  ;;  %v418_v21 = vmul.f32 %v1378_v58, %v416_v3  ;;  %s1514_s9 = sld [smem:[#allocation2 + $0x39]] }
  0x46   : > { %v434_v22 = vstv %s1411_s10  ;;  %v407_v26 = vadd.f32 %v405_v7, %v377_v59  ;;  %v408_v27 = vadd.f32 %v406_v8, %v378_v60  ;;  %v423_v28 = vsel %vm313_vm1, %v421_v9, %v422_v10  ;;  %s1520_s10 = sld [smem:[#allocation2 + $0x2e]] }
  0x47   : > { %v426_v57 = vsel %vm313_vm1, %v422_v10, 0.0  ;;  %v429_v30 = vmul.f32 %v428_v18, %v423_v28  ;;  %v440_v32 = vstv %s1417_s11  ;;  %v446_v33 = vstv %s1419_s15  ;;  %s1527_s11 = sld [smem:[#allocation2 + $0x15]]  ;;  %s1531_s15 = sld [smem:[#allocation2 + $0x21]] }
  0x48   : > { %v430_v31 = vmul.f32 %v428_v18, %v426_v57  ;;  %v413_v58 = vadd.f32 %v411_v15, %v383_v61  ;;  %v414_v34 = vadd.f32 %v412_v16, %v384_v62  ;;  %v435_v35 = vmul.f32 %v434_v22, %v423_v28 }
  0x49   : > { %v462_v36 = vrot.slane %v1442_v25, 7  ;;  %v419_v37 = vadd.f32 %v417_v17, %v389_v11  ;;  %v436_v38 = vmul.f32 %v434_v22, %v426_v57  ;;  %v452_v39 = vstv %s1425_s17  ;;  %s1533_s17 = sld [smem:[#allocation2 + $0x3a]] }
  0x4a   : > { %v463_v40 = vrot.slane %v1449_v29, 7  ;;  %v441_v41 = vmul.f32 %v440_v32, %v423_v28  ;;  %v442_v42 = vmul.f32 %v440_v32, %v426_v57  ;;  %v447_v43 = vmul.f32 %v446_v33, %v423_v28 }
  0x4b   : > { %v469_v44 = vstv %s1431_s18  ;;  %v420_v45 = vadd.f32 %v418_v21, %v390_v12  ;;  %v431_v46 = vadd.f32 %v429_v30, %v395_v13  ;;  %v432_v47 = vadd.f32 %v430_v31, %v396_v14  ;;  %s1537_s18 = sld [smem:[#allocation2 + $0x2f]] }
  0x4c   : > { %v448_v48 = vmul.f32 %v446_v33, %v426_v57  ;;  %v437_v49 = vadd.f32 %v435_v35, %v401_v19  ;;  %v453_v50 = vmul.f32 %v452_v39, %v423_v28  ;;  %v467_v51 = vsel %vm256_vm0, 0.0, %v462_v36 }
  0x4d   : > { %v475_v52 = vstv %s1437_s19  ;;  %v438_v53 = vadd.f32 %v436_v38, %v402_v20  ;;  %v454_v54 = vmul.f32 %v452_v39, %v426_v57  ;;  %v470_v55 = vmul.f32 %v469_v44, %v467_v51  ;;  %s1541_s19 = sld [smem:[#allocation2 + $0x3b]] }
  0x4e   : > { %v481_v56 = vstv %s1444_s20  ;;  %v443_v59 = vadd.f32 %v441_v41, %v407_v26  ;;  %v444_v60 = vadd.f32 %v442_v42, %v408_v27  ;;  %v449_v61 = vadd.f32 %v447_v43, %v413_v58  ;;  %s1548_s20 = sld [smem:[#allocation2 + $0xa]] }
  0x4f   : > { %v464_v62 = vsel %vm256_vm0, %v462_v36, %v463_v40  ;;  %v476_v0 = vmul.f32 %v475_v52, %v467_v51  ;;  %v487_v6 = vstv %s1453_s21  ;;  %v493_v3 = vstv %s1455_s22  ;;  %s1551_s21 = sld [smem:[#allocation2 + $0x16]]  ;;  %s1560_s22 = sld [smem:[#allocation2 + $0x3f]] }
  0x50   : > { %v471_v63 = vmul.f32 %v469_v44, %v464_v62  ;;  %v450_v7 = vadd.f32 %v448_v48, %v414_v34  ;;  %v455_v8 = vadd.f32 %v453_v50, %v419_v37  ;;  %v477_v9 = vmul.f32 %v475_v52, %v464_v62  ;;  %v1509_v50 = vld [vmem:[%s1281_s30 + $0x38] sm:$0xff] }
  0x51   : > { %v482_v10 = vmul.f32 %v481_v56, %v467_v51  ;;  %v456_v11 = vadd.f32 %v454_v54, %v420_v45  ;;  %v472_v12 = vadd.f32 %v470_v55, %v431_v46  ;;  %v483_v13 = vmul.f32 %v481_v56, %v464_v62  ;;  %v1504_v45 = vld [vmem:[%s1281_s30 + $0x30] sm:$0xff]  ;;  %s1525_s30 = sld [smem:[#allocation2 + $0x9]] }
  0x52   : > { %v499_v14 = vstv %s1460_s23  ;;  %v488_v15 = vmul.f32 %v487_v6, %v467_v51  ;;  %v489_v16 = vmul.f32 %v487_v6, %v464_v62  ;;  %v494_v17 = vmul.f32 %v493_v3, %v467_v51  ;;  %s1565_s23 = sld [smem:[#allocation2 + $0x22]] }
  0x53   : > { %v505_v18 = vstv %s1463_s24  ;;  %v473_v19 = vadd.f32 %v471_v63, %v432_v47  ;;  %v478_v20 = vadd.f32 %v476_v0, %v437_v49  ;;  %v495_v21 = vmul.f32 %v493_v3, %v464_v62  ;;  %s1569_s24 = sld [smem:[#allocation2 + $0xb]] }
  0x54   : > { %v511_v22 = vstv %s1465_s25  ;;  %v479_v26 = vadd.f32 %v477_v9, %v438_v53  ;;  %v484_v27 = vadd.f32 %v482_v10, %v443_v59  ;;  %v500_v28 = vmul.f32 %v1442_v25, %v499_v14  ;;  %s1573_s25 = sld [smem:[#allocation2 + $0x40]] }
  0x55   : > { %v501_v57 = vmul.f32 %v1449_v29, %v499_v14  ;;  %v485_v30 = vadd.f32 %v483_v13, %v444_v60  ;;  %v506_v31 = vmul.f32 %v1442_v25, %v505_v18  ;;  %v507_v32 = vmul.f32 %v1449_v29, %v505_v18 }
  0x56   : > { %v517_v33 = vstv %s1470_s27  ;;  %v490_v58 = vadd.f32 %v488_v15, %v449_v61  ;;  %v491_v34 = vadd.f32 %v489_v16, %v450_v7  ;;  %v496_v35 = vadd.f32 %v494_v17, %v455_v8  ;;  %s1578_s27 = sld [smem:[#allocation2 + $0x17]] }
  0x57   : > { %v512_v36 = vmul.f32 %v1442_v25, %v511_v22  ;;  %v497_v37 = vadd.f32 %v495_v21, %v456_v11  ;;  %v523_v38 = vstv %s1475_s28  ;;  %v528_v39 = vrot.slane %v1442_v25, 1  ;;  %s1582_s28 = sld [smem:[#allocation2 + $0x23]] }
  0x58   : > { %v529_v40 = vrot.slane %v1449_v29, 1  ;;  %v502_v41 = vadd.f32 %v500_v28, %v472_v12  ;;  %v503_v42 = vadd.f32 %v501_v57, %v473_v19  ;;  %v513_v43 = vmul.f32 %v1449_v29, %v511_v22 }
  0x59   : > { %v518_v44 = vmul.f32 %v1442_v25, %v517_v33  ;;  %v508_v46 = vadd.f32 %v506_v31, %v478_v20  ;;  %v509_v47 = vadd.f32 %v507_v32, %v479_v26  ;;  %v519_v48 = vmul.f32 %v1449_v29, %v517_v33 }
  0x5a   : > { %v535_v49 = vstv %s1478_s29  ;;  %v514_v51 = vadd.f32 %v512_v36, %v484_v27  ;;  %v524_v52 = vmul.f32 %v1442_v25, %v523_v38  ;;  %v525_v53 = vmul.f32 %v1449_v29, %v523_v38  ;;  %s1598_s29 = sld [smem:[#allocation2 + $0x3c]] }
  0x5b   : > { %v541_v54 = vstv %s1481_s4  ;;  %v530_v55 = vsel %vm313_vm1, %v528_v39, %v529_v40  ;;  %v533_v56 = vsel %vm313_vm1, %v529_v40, 0.0  ;;  %v553_v59 = vstv %s1484_s5  ;;  %s1604_s4 = sld [smem:[#allocation2 + $0x3d]]  ;;  %s1609_s5 = sld [smem:[#allocation2 + $0x3e]] }
  0x5c   : > { %v569_v60 = vrot.slane %v1504_v45, 7  ;;  %v1522_v61 = vadd.f32 %v513_v43, %v485_v30  ;;  %v520_v62 = vadd.f32 %v518_v44, %v490_v58  ;;  %v536_v25 = vmul.f32 %v535_v49, %v530_v55 }
  0x5d   : > { %v570_v29 = vrot.slane %v1509_v50, 7  ;;  %v521_v63 = vadd.f32 %v519_v48, %v491_v34  ;;  %v537_v0 = vmul.f32 %v535_v49, %v533_v56  ;;  %v542_v6 = vmul.f32 %v541_v54, %v530_v55 }
  0x5e   : > { %v547_v3 = vstv %s1491_s6  ;;  %v526_v7 = vadd.f32 %v524_v52, %v496_v35  ;;  %v554_v8 = vmul.f32 %v553_v59, %v530_v55  ;;  %v555_v9 = vmul.f32 %v553_v59, %v533_v56 }
  0x5f   : > { %v559_v10 = vstv %s1494_s7  ;;  %v527_v11 = vadd.f32 %v525_v53, %v497_v37  ;;  %v543_v12 = vmul.f32 %v541_v54, %v533_v56  ;;  %v574_v13 = vsel %vm256_vm0, 0.0, %v569_v60 }
  0x60   : > { %v594_v14 = vstv %s1499_s8  ;;  %v538_v15 = vadd.f32 %v536_v25, %v502_v41  ;;  %v548_v16 = vmul.f32 %v547_v3, %v530_v55  ;;  %v549_v17 = vmul.f32 %v547_v3, %v533_v56  ;;  %s246_s8 = scalar_lea.vmem %s1898_s3, %s1100_s26 }
  0x61   : > { %v571_v18 = vsel %vm256_vm0, %v569_v60, %v570_v29  ;;  %v539_v19 = vadd.f32 %v537_v0, %v503_v42  ;;  %v544_v20 = vadd.f32 %v542_v6, %v508_v46  ;;  %v560_v21 = vmul.f32 %v559_v10, %v530_v55 }
  0x62   : > { %v561_v22 = vmul.f32 %v559_v10, %v533_v56  ;;  %v556_v26 = vadd.f32 %v554_v8, %v520_v62  ;;  %v557_v27 = vadd.f32 %v555_v9, %v521_v63  ;;  %v595_v28 = vmul.f32 %v594_v14, %v574_v13 }
  0x63   : > { %v600_v57 = vstv %s1514_s9  ;;  %v596_v30 = vmul.f32 %v594_v14, %v571_v18  ;;  %v624_v31 = vstv %s1520_s10  ;;  %v635_v32 = vrot.slane %v1504_v45, 1 }
  0x64   : > { %v636_v33 = vrot.slane %v1509_v50, 1  ;;  %v545_v58 = vadd.f32 %v543_v12, %v509_v47  ;;  %v550_v34 = vadd.f32 %v548_v16, %v514_v51  ;;  %v576_v35 = vstv %s1525_s30 }
  0x65   : > { %v582_v36 = vstv %s1527_s11  ;;  %v562_v37 = vadd.f32 %v560_v21, %v526_v7  ;;  %v563_v38 = vadd.f32 %v561_v22, %v527_v11  ;;  %v601_v39 = vmul.f32 %v600_v57, %v574_v13 }
  0x66   : > { %v602_v40 = vmul.f32 %v600_v57, %v571_v18  ;;  %v588_v41 = vstv %s1531_s15  ;;  %v597_v42 = vadd.f32 %v595_v28, %v556_v26  ;;  %v625_v43 = vmul.f32 %v1504_v45, %v624_v31 }
  0x67   : > { %v630_v44 = vstv %s1533_s17  ;;  %v598_v46 = vadd.f32 %v596_v30, %v557_v27  ;;  %v626_v47 = vmul.f32 %v1509_v50, %v624_v31  ;;  %v1557_v48 = vsel %vm313_vm1, %v635_v32, %v636_v33 }
  0x68   : > { %v660_v49 = vstv %s1537_s18  ;;  %v577_v51 = vmul.f32 %v576_v35, %v574_v13  ;;  %v578_v52 = vmul.f32 %v576_v35, %v571_v18  ;;  %v583_v53 = vmul.f32 %v582_v36, %v574_v13 }
  0x69   : > { %v1563_v54 = vsel %vm313_vm1, %v636_v33, 0.0  ;;  %v584_v55 = vmul.f32 %v582_v36, %v571_v18  ;;  %v603_v56 = vadd.f32 %v601_v39, %v562_v37  ;;  %v604_v59 = vadd.f32 %v602_v40, %v563_v38 }
  0x6a   : > { %v631_v60 = vmul.f32 %v1504_v45, %v630_v44  ;;  %v627_v62 = vadd.f32 %v625_v43, %v597_v42  ;;  %v632_v25 = vmul.f32 %v1509_v50, %v630_v44  ;;  %v661_v29 = vmul.f32 %v660_v49, %v1557_v48 }
  0x6b   : > { %v666_v63 = vstv %s1541_s19  ;;  %v551_v0 = vadd.f32 %v549_v17, %v1522_v61  ;;  %v589_v6 = vmul.f32 %v588_v41, %v574_v13  ;;  %v628_v3 = vadd.f32 %v626_v47, %v598_v46 }
  0x6c   : > { %v662_v7 = vmul.f32 %v660_v49, %v1563_v54  ;;  %v579_v8 = vadd.f32 %v577_v51, %v538_v15  ;;  %v580_v9 = vadd.f32 %v578_v52, %v539_v19  ;;  %v585_v10 = vadd.f32 %v583_v53, %v544_v20 }
  0x6d   : > { %v590_v11 = vmul.f32 %v588_v41, %v571_v18  ;;  %v586_v12 = vadd.f32 %v584_v55, %v545_v58  ;;  %v606_v14 = vstv %s1548_s20  ;;  %v633_v16 = vadd.f32 %v631_v60, %v603_v56 }
  0x6e   : > { %v667_v21 = vmul.f32 %v666_v63, %v1557_v48  ;;  %v612_v22 = vstv %s1551_s21  ;;  %v634_v26 = vadd.f32 %v632_v25, %v604_v59  ;;  %v663_v61 = vadd.f32 %v661_v29, %v627_v62 }
  0x6f   : > { %v668_v13 = vmul.f32 %v666_v63, %v1563_v54  ;;  %v664_v15 = vadd.f32 %v662_v7, %v628_v3  ;;  %v684_v17 = vstv %s1560_s22  ;;  %v763_v18 = vadd.f32 1e-06, %v1308_v4 }
  0x70   : > { %v764_v19 = vadd.f32 1e-06, %v1314_v5  ;;  %v591_v20 = vadd.f32 %v589_v6, %v550_v34  ;;  %v592_v27 = vadd.f32 %v590_v11, %v551_v0  ;;  %v607_v28 = vmul.f32 %v1504_v45, %v606_v14 }
  0x71   : > { %v608_v57 = vmul.f32 %v1509_v50, %v606_v14  ;;  %v613_v30 = vmul.f32 %v1504_v45, %v612_v22  ;;  %v618_v31 = vstv %s1565_s23  ;;  %v669_v32 = vadd.f32 %v667_v21, %v633_v16 }
  0x72   : > { %1138 = vrcp.f32 %v763_v18  ;;  %v642_v33 = vstv %s1569_s24  ;;  %v685_v58 = vadd.f32 %v684_v17, %v663_v61  ;;  %v688_v35 = vstv %s1573_s25 }
  0x73   : > { %1140 = vrcp.f32 %v764_v19  ;;  %v614_v36 = vmul.f32 %v1509_v50, %v612_v22  ;;  %v670_v37 = vadd.f32 %v668_v13, %v634_v26  ;;  %v686_v34 = vadd.f32 %v684_v17, %v664_v15 }
  0x74   : > { %1142 = vrsqrt.f32 %v1342_v23  ;;  %v609_v38 = vadd.f32 %v607_v28, %v579_v8  ;;  %v610_v39 = vadd.f32 %v608_v57, %v580_v9  ;;  %v619_v40 = vmul.f32 %v1504_v45, %v618_v31 }
  0x75   : > { %v620_v41 = vmul.f32 %v1509_v50, %v618_v31  ;;  %v615_v42 = vadd.f32 %v613_v30, %v585_v10  ;;  %v643_v43 = vmul.f32 %v642_v33, %v1557_v48  ;;  %v648_v44 = vstv %s1578_s27 }
  0x76   : > { %v689_v46 = vadd.f32 %v688_v35, %v669_v32  ;;  %v644_v47 = vmul.f32 %v642_v33, %v1563_v54  ;;  %v654_v49 = vstv %s1582_s28  ;;  %1144 = vrsqrt.f32 %v1344_v24 }
  0x77   : > { %v1607_v51 = vadd.f32 1e-12, %v685_v58  ;;  %v690_v45 = vadd.f32 %v688_v35, %v670_v37  ;;  %v741_v50 = vmul.f32 %v685_v58, %v685_v58  ;;  %v1611_v53 = vadd.f32 1e-12, %v686_v34 }
  0x78   : > { %v743_v52 = vmul.f32 %v689_v46, %v689_v46  ;;  %v616_v55 = vadd.f32 %v614_v36, %v586_v12  ;;  %v621_v56 = vadd.f32 %v619_v40, %v591_v20  ;;  %v649_v59 = vmul.f32 %v648_v44, %v1557_v48 }
  0x79   : > { %v650_v60 = vmul.f32 %v648_v44, %v1563_v54  ;;  %v655_v62 = vmul.f32 %v654_v49, %v1557_v48  ;;  %v742_v25 = vmul.f32 %v686_v34, %v686_v34  ;;  %v744_v29 = vmul.f32 %v690_v45, %v690_v45 }
  0x7a   : > { %v817_v63 = vadd.f32 1e-06, %v1607_v51  ;;  %v818_v0 = vadd.f32 1e-06, %v1611_v53  ;;  %v645_v3 = vadd.f32 %v643_v43, %v609_v38  ;;  %v646_v7 = vadd.f32 %v644_v47, %v610_v39 }
  0x7b   : > { %v745_v8 = vadd.f32 %v743_v52, %v741_v50  ;;  %v622_v10 = vadd.f32 %v620_v41, %v592_v27  ;;  %v656_v11 = vmul.f32 %v654_v49, %v1563_v54  ;;  %v672_v12 = vstv %s1598_s29 }
  0x7c   : > { %v1139_v6 = vpop.eup %1138  ;;  %1146 = vrcp.f32 %v817_v63  ;;  %v651_v16 = vadd.f32 %v649_v59, %v615_v42  ;;  %v652_v21 = vadd.f32 %v650_v60, %v616_v55  ;;  %v657_v22 = vadd.f32 %v655_v62, %v621_v56 }
  0x7d   : > { %v1141_v9 = vpop.eup %1140  ;;  %v766_v48 = vmul.f32 %v1139_v6, %v1299_v1  ;;  %v746_v26 = vadd.f32 %v744_v29, %v742_v25  ;;  %v676_v61 = vstv %s1604_s4  ;;  %1148 = vrcp.f32 %v818_v0 }
  0x7e   : > { %v1143_v14 = vpop.eup %1142  ;;  %v768_v13 = vmul.f32 %v1141_v9, %v1301_v2  ;;  %v1625_v17 = vadd.f32 %v672_v12, %v645_v3  ;;  %v1627_v18 = vadd.f32 %v672_v12, %v646_v7  ;;  %v680_v19 = vstv %s1609_s5 }
  0x7f   : > { %v1623_v15 = vclamps-f32 %v766_v48, 1e+18  ;;  %v1630_v54 = vmax.f32 %v745_v8, 1e-12  ;;  %v658_v27 = vadd.f32 %v656_v11, %v622_v10  ;;  %v698_v28 = vmul.f32 %v1143_v14, %v1342_v23 }
  0x80   : > { %v1145_v20 = vpop.eup %1144  ;;  %v1633_v57 = vclamps-f32 %v768_v13, 1e+18  ;;  %v1637_v31 = vadd.f32 %v676_v61, %v651_v16  ;;  %v1639_v32 = vadd.f32 %v676_v61, %v652_v21  ;;  %vm699_vm2 = vcmp.eq.f32.partialorder %v1342_v23, inf }
  0x81   : > { %v773_v30 = vmul.f32 %v1623_v15, %v1623_v15  ;;  %v1642_v33 = vmax.f32 %v746_v26, 1e-12  ;;  %v1644_v58 = vadd.f32 %v680_v19, %v657_v22  ;;  %v1648_v37 = vadd.f32 1e-12, %v689_v46 }
  0x82   : > { %v774_v35 = vmul.f32 %v1633_v57, %v1633_v57  ;;  %vm701_vm3 = vcmp.eq.f32.partialorder %v1342_v23, 0.0  ;;  %v702_v34 = vand.u32 2147483648, %v1342_v23  ;;  %v705_v38 = vmul.f32 %v1145_v20, %v1344_v24 }
  0x83   : > { %v775_v36 = vadd.f32 1.0, %v773_v30  ;;  %1150 = vrsqrt.f32 %v1630_v54  ;;  %v700_v39 = vsel %vm699_vm2, %v1342_v23, %v698_v28  ;;  %vm706_vm4 = vcmp.eq.f32.partialorder %v1344_v24, inf }
  0x84   : > { %v776_v40 = vadd.f32 1.0, %v774_v35  ;;  %v1656_v42 = vadd.f32 %v680_v19, %v658_v27  ;;  %v1659_v43 = vadd.f32 1e-12, %v690_v45  ;;  %vm708_vm5 = vcmp.eq.f32.partialorder %v1344_v24, 0.0 }
  0x85   : > { %1152 = vrsqrt.f32 %v775_v36  ;;  %v709_v44 = vand.u32 2147483648, %v1344_v24  ;;  %v703_v47 = vsel %vm701_vm3, %v702_v34, %v700_v39  ;;  %v707_v49 = vsel %vm706_vm4, %v1344_v24, %v705_v38 }
  0x86   : > { %v1147_v41 = vpop.eup %1146  ;;  %1154 = vrsqrt.f32 %v1642_v33  ;;  %v719_v50 = vmax.f32 %v1625_v17, 0.0  ;;  %v720_v52 = vmax.f32 %v1627_v18, 0.0  ;;  %v723_v45 = vmax.f32 %v1637_v31, 0.0 }
  0x87   : > { %1156 = vrsqrt.f32 %v776_v40  ;;  %v820_v46 = vmul.f32 %v1147_v41, %v1648_v37  ;;  %v1149_v55 = vpop.eup %1148  ;;  %v724_v56 = vmax.f32 %v1639_v32, 0.0  ;;  %v735_v59 = vmax.f32 %v1644_v58, 0.0 }
  0x88   : > { %v736_v62 = vmax.f32 %v1656_v42, 0.0  ;;  %vm781_vm6 = vcmp.lt.f32.partialorder %v1308_v4, 0.0  ;;  %vm782_vm7 = vcmp.lt.f32.partialorder %v1314_v5, 0.0  ;;  %v822_v23 = vmul.f32 %v1149_v55, %v1659_v43 }
  0x89   : > { %v1672_v60 = vclamps-f32 %v820_v46, 1e+18  ;;  %v710_v25 = vsel %vm708_vm5, %v709_v44, %v707_v49  ;;  %v713_v29 = vrot.slane %v703_v47, 7  ;;  %vm783_vm8 = vcmp.ne.f32.partialorder %v1299_v1, 0.0 }
  0x8a   : > { %vm784_vm9 = vcmp.ne.f32.partialorder %v1301_v2, 0.0  ;;  %vm795_vm10 = vcmp.eq.f32.partialorder %v1308_v4, 0.0  ;;  %vm796_vm11 = vcmp.eq.f32.partialorder %v1314_v5, 0.0  ;;  %v1686_v0 = vclamps-f32 %v822_v23, 1e+18  ;;  %vm1703_vm5 = vmand %vm781_vm6, %vm783_vm8 }
  0x8b   : > { %v827_v63 = vmul.f32 %v1672_v60, %v1672_v60  ;;  %vm797_vm12 = vcmp.gt.f32.partialorder %v1299_v1, 0.0  ;;  %vm798_vm13 = vcmp.gt.f32.partialorder %v1301_v2, 0.0  ;;  %vm801_vm14 = vcmp.lt.f32.partialorder %v1299_v1, 0.0  ;;  %vm1712_vm3 = vmand %vm782_vm7, %vm784_vm9 }
  0x8c   : > { %v714_v3 = vrot.slane %v710_v25, 7  ;;  %vm751_vm15 = vcmp.eq.f32.partialorder %v1630_v54, inf  ;;  %vm802_vm2 = vcmp.lt.f32.partialorder %v1301_v2, 0.0  ;;  %v828_v7 = vmul.f32 %v1686_v0, %v1686_v0  ;;  %vm1722_vm8 = vmand %vm795_vm10, %vm797_vm12 }
  0x8d   : > { %v829_v24 = vadd.f32 1.0, %v827_v63  ;;  %v1151_v6 = vpop.eup %1150  ;;  %v718_v9 = vsel %vm256_vm0, 0.0, %v713_v29  ;;  %v754_v10 = vand.u32 2147483648, %v1630_v54  ;;  %vm758_vm4 = vcmp.eq.f32.partialorder %v1642_v33, inf  ;;  %vm1733_vm9 = vmand %vm795_vm10, %vm801_vm14 }
  0x8e   : > { %v729_v48 = vrot.slane %v703_v47, 1  ;;  %v730_v14 = vrot.slane %v710_v25, 1  ;;  %v830_v22 = vadd.f32 1.0, %v828_v7  ;;  %v725_v61 = vmul.f32 %v723_v45, %v703_v47  ;;  %vm1742_vm12 = vmand %vm796_vm11, %vm798_vm13 }
  0x8f   : > { %v1153_v8 = vpop.eup %1152  ;;  %1158 = vrsqrt.f32 %v829_v24  ;;  %v761_v13 = vand.u32 2147483648, %v1642_v33  ;;  %v715_v17 = vsel %vm256_vm0, %v713_v29, %v714_v3  ;;  %v721_v18 = vmul.f32 %v719_v50, %v718_v9  ;;  %vm1754_vm10 = vmand %vm796_vm11, %vm802_vm2 }
  0x90   : > { %v1155_v12 = vpop.eup %1154  ;;  %v779_v16 = vmul.f32 %v1153_v8, %v1623_v15  ;;  %v750_v28 = vmul.f32 %v1151_v6, %v1630_v54  ;;  %1160 = vrsqrt.f32 %v830_v22  ;;  %vm849_vm0 = vcmp.eq.f32.partialorder %v1607_v51, 0.0 }
  0x91   : > { %v1157_v26 = vpop.eup %1156  ;;  %vm851_vm6 = vcmp.gt.f32.partialorder %v1648_v37, 0.0  ;;  %v731_v1 = vsel %vm313_vm1, %v729_v48, %v730_v14  ;;  %v757_v4 = vmul.f32 %v1155_v12, %v1642_v33  ;;  %vm855_vm13 = vcmp.lt.f32.partialorder %v1648_v37, 0.0 }
  0x92   : > { %v780_v19 = vmul.f32 %v1157_v26, %v1633_v57  ;;  %v791_v20 = vsub.f32 0.0, %v779_v16  ;;  %v787_v57 = vsub.f32 0.0, %v1153_v8  ;;  %v722_v32 = vmul.f32 %v720_v52, %v715_v17  ;;  %vm1787_vm11 = vmand %vm849_vm0, %vm855_vm13 }
  0x93   : > { %v726_v35 = vmul.f32 %v724_v56, %v710_v25  ;;  %v734_v36 = vsel %vm313_vm1, %v730_v14, 0.0  ;;  %vm835_vm7 = vcmp.lt.f32.partialorder %v1607_v51, 0.0  ;;  %vm852_vm2 = vcmp.gt.f32.partialorder %v1659_v43, 0.0  ;;  %vm1773_vm1 = vmand %vm849_vm0, %vm851_vm6 }
  0x94   : > { %v792_v2 = vsub.f32 0.0, %v780_v19  ;;  %v793_v5 = vsel %vm1703_vm5, %v791_v20, %v779_v16  ;;  %v727_v38 = vadd.f32 %v725_v61, %v721_v18  ;;  %v737_v39 = vmul.f32 %v735_v59, %v731_v1  ;;  %vm859_vm13 = vmor %vm1773_vm1, %vm1787_vm11 }
  0x95   : > { %v752_v40 = vsel %vm751_vm15, %v1630_v54, %v750_v28  ;;  %v759_v44 = vsel %vm758_vm4, %v1642_v33, %v757_v4  ;;  %v788_v58 = vsub.f32 0.0, %v1157_v26  ;;  %v789_v46 = vsel %vm1703_vm5, %v787_v57, %v1153_v8 }
  0x96   : > { %vm1917_vm15 = vcmp.ne.f32.partialorder %v1648_v37, 0.0  ;;  %vm856_vm14 = vcmp.lt.f32.partialorder %v1659_v43, 0.0  ;;  %v728_v49 = vadd.f32 %v726_v35, %v722_v32  ;;  %v738_v50 = vmul.f32 %v736_v62, %v734_v36 }
  0x97   : > { %vm1798_vm6 = vmand %vm835_vm7, %vm1917_vm15  ;;  %v809_v52 = vsel %vm1722_vm8, 1.0, %v793_v5  ;;  %vm836_vm4 = vcmp.lt.f32.partialorder %v1611_v53, 0.0  ;;  %vm1920_vm5 = vcmp.eq.f32.partialorder %v1611_v53, 0.0  ;;  %vm1923_vm0 = vcmp.eq.f32.partialorder %v1630_v54, 0.0 }
  0x98   : > { %vm1812_vm7 = vmand %vm1920_vm5, %vm852_vm2  ;;  %v755_v55 = vsel %vm1923_vm0, %v754_v10, %v752_v40  ;;  %v794_v42 = vsel %vm1712_vm3, %v792_v2, %v780_v19  ;;  %v739_v59 = vadd.f32 %v737_v39, %v727_v38  ;;  %vm1924_vm2 = vcmp.eq.f32.partialorder %v1642_v33, 0.0 }
  0x99   : > { %v1159_v51 = vpop.eup %1158  ;;  %v762_v62 = vsel %vm1924_vm2, %v761_v13, %v759_v44  ;;  %vm1925_vm15 = vmor %vm1722_vm8, %vm1733_vm9  ;;  %v790_v23 = vsel %vm1712_vm3, %v788_v58, %v1157_v26  ;;  %v811_v33 = vsel %vm1733_vm9, -1.0, %v809_v52  ;;  %v740_v24 = vadd.f32 %v738_v50, %v728_v49 }
  0x9a   : > { %v833_v45 = vmul.f32 %v1159_v51, %v1672_v60  ;;  %v841_v56 = vsub.f32 0.0, %v1159_v51  ;;  %v807_v54 = vsel %vm1925_vm15, 0.0, %v789_v46  ;;  %vm1836_vm0 = vmand %vm1920_vm5, %vm856_vm14  ;;  %v1161_v63 = vpop.eup %1160  ;;  %v810_v6 = vsel %vm1742_vm12, 1.0, %v794_v42 }
  0x9b   : > { %vm806_vm2 = vmor %vm1742_vm12, %vm1754_vm10  ;;  %vm1928_vm8 = vcmp.ne.f32.partialorder %v1659_v43, 0.0  ;;  %v867_v8 = vmax.f32 %v755_v55, 0.0  ;;  %v834_v9 = vmul.f32 %v1161_v63, %v1686_v0  ;;  %v842_v10 = vsub.f32 0.0, %v1161_v63 }
  0x9c   : > { %v843_v25 = vsel %vm1798_vm6, %v841_v56, %v1159_v51  ;;  %v845_v29 = vsub.f32 0.0, %v833_v45  ;;  %vm1856_vm3 = vmand %vm836_vm4, %vm1928_vm8  ;;  %v868_v43 = vmax.f32 %v762_v62, 0.0  ;;  %v808_v12 = vsel %vm806_vm2, 0.0, %v790_v23 }
  0x9d   : > { %v861_v7 = vsel %vm859_vm13, 0.0, %v843_v25  ;;  %vm860_vm9 = vmor %vm1812_vm7, %vm1836_vm0  ;;  %v812_v0 = vsel %vm1754_vm10, -1.0, %v810_v6  ;;  %v844_v16 = vsel %vm1856_vm3, %v842_v10, %v1161_v63  ;;  %v846_v21 = vsub.f32 0.0, %v834_v9 }
  0x9e   : > { %v847_v11 = vsel %vm1798_vm6, %v845_v29, %v833_v45  ;;  %v871_v48 = vmul.f32 %v861_v7, %v807_v54  ;;  %v882_v14 = vmul.f32 %v861_v7, %v811_v33  ;;  %v862_v26 = vsel %vm860_vm9, 0.0, %v844_v16 }
  0x9f   : > { %v863_v53 = vsel %vm1773_vm1, 1.0, %v847_v11  ;;  %v869_v61 = vmul.f32 %v867_v8, %v739_v59  ;;  %v848_v17 = vsel %vm1856_vm3, %v846_v21, %v834_v9  ;;  %v872_v18 = vmul.f32 %v862_v26, %v808_v12 }
  0xa0   : > { %v865_v22 = vsel %vm1787_vm11, -1.0, %v863_v53  ;;  %v864_v19 = vsel %vm1812_vm7, 1.0, %v848_v17  ;;  %v883_v27 = vmul.f32 %v862_v26, %v812_v0  ;;  %v870_v1 = vmul.f32 %v868_v43, %v740_v24 }
  0xa1   : > { %v873_v13 = vmul.f32 %v865_v22, %v811_v33  ;;  %v884_v15 = vmul.f32 %v865_v22, %v807_v54  ;;  %v866_v30 = vsel %vm1836_vm0, -1.0, %v864_v19  ;;  %vm879_vm12 = vcmask 64512  }
  0xa2   : > { %v874_v4 = vmul.f32 %v866_v30, %v812_v0  ;;  %v885_v31 = vmul.f32 %v866_v30, %v808_v12 }
  0xa3   : > { %v875_v20 = vsub.f32 %v871_v48, %v873_v13  ;;  %v886_v28 = vadd.f32 %v884_v15, %v882_v14 }
  0xa4   : > { %v876_v35 = vsub.f32 %v872_v18, %v874_v4  ;;  %v887_v36 = vadd.f32 %v885_v31, %v883_v27 }
  0xa5   : > { %v877_v57 = vmul.f32 %v875_v20, %v869_v61  ;;  %v888_v32 = vmul.f32 %v886_v28, %v869_v61 }
  0xa6   : > { %v878_v2 = vmul.f32 %v876_v35, %v870_v1  ;;  %v889_v5 = vmul.f32 %v887_v36, %v870_v1 }
  0xa7   : > { %880 = vst.msk [vmem:[%s246_s8] sm:$0xff] %vm879_vm12, %v877_v57  ;;  %1096 = vst.msk [vmem:[%s246_s8 + $0x10] sm:$0xff] %vm879_vm12, %v888_v32 }
  0xa8   : > { %881 = vst.msk [vmem:[%s246_s8 + $0x8] sm:$0xff] %vm879_vm12, %v878_v2  ;;  %1097 = vst.msk [vmem:[%s246_s8 + $0x18] sm:$0xff] %vm879_vm12, %v889_v5 }
  0xa9 PF: > { %s14_s14 = sadd.s32 1, %s1203_s14   ;;  %s1931_s12 = smov %s1199_s13 }
  0xaa   : > { %p11_p2 = scmp.ge.s32.totalorder %s14_s14, 4   ;;  %s1932_s13 = smov %s1934_s16 }
  0xac   :  { %13 = sbr.rel (!%p11_p2) target bundleno = 2 (0x2), region = 75 }
  0xb3   :  { %920 = vsyncpa [#allocation3], 1 }
  0xb4   :  { %922 = vsyncpa [#allocation3 + $0x1], 1 }

</bundles_post_ra>
